<compile_context>
chip_gen: v7x
topology: tpu7x:2x2x1
jax: 0.10.0
libtpu: 0.0.40
codegen_flags: <defaults>
</compile_context>

<pallas_src>
import functools

import jax
import jax.numpy as jnp
from jax import lax
from jax.experimental import pallas as pl
from jax.experimental.pallas import tpu as pltpu


def centrality_kernel(x_ref, src_ref, dst_ref, z_cat_ref, o_ref, *, k_in, chunk):
    tn, _ = x_ref.shape
    e_pad = src_ref.shape[1]
    k_total = z_cat_ref.shape[0]
    k_out = k_total - k_in
    n_chunks = e_pad // chunk

    # Global node id of each row in this tile, broadcast along the edge-chunk
    # axis once (hoisted out of the loop; JAX does not CSE broadcast_in_dim).
    tile_base = pl.program_id(0) * tn
    node_ids = lax.broadcasted_iota(jnp.int32, (tn, chunk), 0) + tile_base

    # ---- chunked degree accumulation (VPU compare + cross-lane sum) ----
    def body(c, carry):
        in_acc, out_acc = carry
        start = pl.multiple_of(c * chunk, chunk)
        dst_c = dst_ref[:, pl.ds(start, chunk)]   # [1, chunk] -> broadcast vs [tn, chunk]
        src_c = src_ref[:, pl.ds(start, chunk)]   # [1, chunk]
        in_acc = in_acc + jnp.sum((dst_c == node_ids).astype(jnp.int32),
                                  axis=1, keepdims=True)
        out_acc = out_acc + jnp.sum((src_c == node_ids).astype(jnp.int32),
                                    axis=1, keepdims=True)
        return in_acc, out_acc

    zeros = jnp.zeros((tn, 1), jnp.int32)
    in_deg, out_deg = lax.fori_loop(0, n_chunks, body, (zeros, zeros),
                                    unroll=n_chunks <= 8)

    # Clamp for gather-safe parity with the PyTorch table lookup.
    in_deg = jnp.minimum(in_deg, k_in - 1)
    out_deg = jnp.minimum(out_deg, k_out - 1)

    # ---- fused one-hot gather: single MXU matmul against [K_in+K_out, D] ----
    # Columns [0, k_in) select z_in rows, [k_in, k_total) select z_out rows;
    # the index ranges are disjoint so one OR builds the combined one-hot.
    col = lax.broadcasted_iota(jnp.int32, (tn, k_total), 1)
    onehot = ((col == in_deg) | (col == (out_deg + k_in))).astype(jnp.float32)
    gathered = jnp.dot(onehot, z_cat_ref[...],
                       preferred_element_type=jnp.float32)            # [tn, D]

    o_ref[...] = (x_ref[...].astype(jnp.float32) + gathered).astype(o_ref.dtype)


def centrality_encoding(x, edge_index, z_in, z_out, *, tile_n=128, edge_chunk=512):
    """x: [N, D] float, edge_index: [2, E] int, z_in: [K_in, D], z_out: [K_out, D]."""
    N, D = x.shape
    E = edge_index.shape[1]
    k_in = z_in.shape[0]

    # Edge lists as [1, E_pad] int32 row vectors, padded with -1 (never matches
    # a valid node id). Chunk is a multiple of 128 (full-lane loads).
    chunk = min(edge_chunk, max(128, pl.next_power_of_2(E)))
    e_pad = chunk * pl.cdiv(E, chunk)
    src = edge_index[0].reshape(1, E).astype(jnp.int32)
    dst = edge_index[1].reshape(1, E).astype(jnp.int32)
    if e_pad != E:
        fill = jnp.full((1, e_pad - E), -1, jnp.int32)
        src = jnp.concatenate([src, fill], axis=1)
        dst = jnp.concatenate([dst, fill], axis=1)

    # Fused embedding table for the single-matmul gather.
    z_cat = jnp.concatenate([z_in, z_out], axis=0).astype(jnp.float32)

    # Node tile size: full N, or a multiple of 8 (sublane rule).
    tn = min(tile_n, N)
    if tn != N and tn % 8:
        tn = max(8, (tn // 8) * 8)
    grid = (pl.cdiv(N, tn),)

    kernel = functools.partial(centrality_kernel, k_in=k_in, chunk=chunk)

    return pl.pallas_call(
        kernel,
        out_shape=jax.ShapeDtypeStruct((N, D), x.dtype),
        grid=grid,
        in_specs=[
            pl.BlockSpec((tn, D), lambda i: (i, 0)),        # x: tiled over nodes
            pl.BlockSpec((1, e_pad), lambda i: (0, 0)),     # src: resident across steps
            pl.BlockSpec((1, e_pad), lambda i: (0, 0)),     # dst: resident across steps
            pl.BlockSpec(z_cat.shape, lambda i: (0, 0)),    # fused table: resident
        ],
        out_specs=pl.BlockSpec((tn, D), lambda i: (i, 0)),
        # Mirrors the module's in-place `x += ...`; donate x under jit to reuse
        # the HBM buffer, otherwise XLA inserts a defensive copy (still correct).
        input_output_aliases={0: 0},
        compiler_params=pltpu.CompilerParams(
            dimension_semantics=("parallel",),
            vmem_limit_bytes=32 * 1024 * 1024,
        ),
    )(x, src, dst, z_cat)


if __name__ == "__main__":
    key = jax.random.PRNGKey(0)
    k_x, k_e, k_zi, k_zo = jax.random.split(key, 4)

    num_nodes = 256
    node_dim = 128          # lane-dense output (full 128-lane stores)
    max_in_degree = 16
    max_out_degree = 16
    num_edges = 300

    x = jax.random.normal(k_x, (num_nodes, node_dim), dtype=jnp.float32)
    edge_index = jax.random.randint(k_e, (2, num_edges), 0, num_nodes,
                                    dtype=jnp.int32)
    # deterministic stand-ins for nn.Parameter(torch.randn(...))
    z_in = jax.random.normal(k_zi, (max_in_degree, node_dim), dtype=jnp.float32)
    z_out = jax.random.normal(k_zo, (max_out_degree, node_dim), dtype=jnp.float32)

    out = centrality_encoding(x, edge_index, z_in, z_out)
    out = jax.block_until_ready(out)

    # pure-JAX reference mirroring the PyTorch forward (degree + table lookup,
    # with clamping to the last table row for out-of-range degrees)
    in_deg = jnp.zeros((num_nodes,), jnp.int32).at[edge_index[1]].add(1)
    out_deg = jnp.zeros((num_nodes,), jnp.int32).at[edge_index[0]].add(1)
    in_deg = jnp.minimum(in_deg, max_in_degree - 1)
    out_deg = jnp.minimum(out_deg, max_out_degree - 1)
    ref = x + z_in[in_deg] + z_out[out_deg]
    assert jnp.allclose(out, ref, atol=1e-5), "mismatch vs reference"

    print("KERNEL_OK")
</pallas_src>

<mosaic_0001>
module attributes {stable_mosaic.version = 11 : i64} {
  func.func @centrality_kernel(%arg0: i32, %arg1: memref<128x128xf32, #tpu.memory_space<vmem>>, %arg2: memref<1x512xi32, #tpu.memory_space<vmem>>, %arg3: memref<1x512xi32, #tpu.memory_space<vmem>>, %arg4: memref<32x128xf32, #tpu.memory_space<vmem>>, %arg5: memref<128x128xf32, #tpu.memory_space<vmem>>) attributes {dimension_semantics = [#tpu.dimension_semantics<parallel>], iteration_bounds = array<i64: 2>, scalar_prefetch = 0 : i64, scratch_operands = 0 : i64, tpu.core_type = #tpu.core_type<tc>, window_params = [{transform_indices = @transform_0, window_bounds = array<i64: 128, 128>}, {pipeline_mode = #tpu.pipeline_mode<synchronous>, transform_indices = @transform_1, window_bounds = array<i64: 1, 512>}, {pipeline_mode = #tpu.pipeline_mode<synchronous>, transform_indices = @transform_2, window_bounds = array<i64: 1, 512>}, {pipeline_mode = #tpu.pipeline_mode<synchronous>, transform_indices = @transform_3, window_bounds = array<i64: 32, 128>}, {transform_indices = @transform_4, window_bounds = array<i64: 128, 128>}]} {
    %c128_i32 = arith.constant 128 : i32
    %0 = arith.muli %arg0, %c128_i32 : i32
    %1 = tpu.iota {dimensions = array<i32: 0>} : vector<128x512xi32>
    %2 = vector.broadcast %0 : i32 to vector<128x512xi32>
    %3 = arith.addi %1, %2 : vector<128x512xi32>
    %c0_i32 = arith.constant 0 : i32
    %4 = vector.broadcast %c0_i32 : i32 to vector<128x1xi32>
    %c0_i32_0 = arith.constant 0 : i32
    %c512_i32 = arith.constant 512 : i32
    %5 = arith.muli %c0_i32_0, %c512_i32 : i32
    %6 = tpu.assume_multiple %5, 512 : i32
    %c0 = arith.constant 0 : index
    %7 = arith.index_cast %6 : i32 to index
    %8 = vector.load %arg3[%c0, %7] : memref<1x512xi32, #tpu.memory_space<vmem>>, vector<1x512xi32>
    %c0_1 = arith.constant 0 : index
    %9 = arith.index_cast %6 : i32 to index
    %10 = vector.load %arg2[%c0_1, %9] : memref<1x512xi32, #tpu.memory_space<vmem>>, vector<1x512xi32>
    %11 = vector.broadcast %8 : vector<1x512xi32> to vector<128x512xi32>
    %12 = arith.cmpi eq, %11, %3 : vector<128x512xi32>
    %13 = arith.extui %12 : vector<128x512xi1> to vector<128x512xi32>
    %cst = arith.constant dense<0> : vector<128xi32>
    %14 = vector.multi_reduction <add>, %13, %cst [1] : vector<128x512xi32> to vector<128xi32>
    %15 = vector.shape_cast %14 : vector<128xi32> to vector<128x1xi32>
    %16 = arith.addi %4, %15 : vector<128x1xi32>
    %17 = vector.broadcast %10 : vector<1x512xi32> to vector<128x512xi32>
    %18 = arith.cmpi eq, %17, %3 : vector<128x512xi32>
    %19 = arith.extui %18 : vector<128x512xi1> to vector<128x512xi32>
    %cst_2 = arith.constant dense<0> : vector<128xi32>
    %20 = vector.multi_reduction <add>, %19, %cst_2 [1] : vector<128x512xi32> to vector<128xi32>
    %21 = vector.shape_cast %20 : vector<128xi32> to vector<128x1xi32>
    %22 = arith.addi %4, %21 : vector<128x1xi32>
    %c1_i32 = arith.constant 1 : i32
    %c15_i32 = arith.constant 15 : i32
    %23 = vector.broadcast %c15_i32 : i32 to vector<128x1xi32>
    %24 = arith.minsi %16, %23 : vector<128x1xi32>
    %c15_i32_3 = arith.constant 15 : i32
    %25 = vector.broadcast %c15_i32_3 : i32 to vector<128x1xi32>
    %26 = arith.minsi %22, %25 : vector<128x1xi32>
    %27 = tpu.iota {dimensions = array<i32: 1>} : vector<128x32xi32>
    %28 = vector.broadcast %24 : vector<128x1xi32> to vector<128x32xi32>
    %29 = arith.cmpi eq, %27, %28 : vector<128x32xi32>
    %c16_i32 = arith.constant 16 : i32
    %30 = vector.broadcast %c16_i32 : i32 to vector<128x1xi32>
    %31 = arith.addi %26, %30 : vector<128x1xi32>
    %32 = vector.broadcast %31 : vector<128x1xi32> to vector<128x32xi32>
    %33 = arith.cmpi eq, %27, %32 : vector<128x32xi32>
    %34 = arith.ori %29, %33 : vector<128x32xi1>
    %35 = arith.extui %34 : vector<128x32xi1> to vector<128x32xi32>
    %36 = arith.sitofp %35 : vector<128x32xi32> to vector<128x32xf32>
    %c0_4 = arith.constant 0 : index
    %c0_5 = arith.constant 0 : index
    %37 = vector.load %arg4[%c0_4, %c0_5] : memref<32x128xf32, #tpu.memory_space<vmem>>, vector<32x128xf32>
    %cst_6 = arith.constant dense<0.000000e+00> : vector<128x128xf32>
    %38 = tpu.matmul %36, %37, %cst_6 {dimension_numbers = #tpu.dot_dimension_numbers<[1], [0], [0], [1], [0, 0, 1, 1], [], []>} : vector<128x32xf32>, vector<32x128xf32>, vector<128x128xf32> -> vector<128x128xf32>
    %c0_7 = arith.constant 0 : index
    %c0_8 = arith.constant 0 : index
    %39 = vector.load %arg1[%c0_7, %c0_8] : memref<128x128xf32, #tpu.memory_space<vmem>>, vector<128x128xf32>
    %40 = arith.addf %39, %38 : vector<128x128xf32>
    %c0_9 = arith.constant 0 : index
    %c0_10 = arith.constant 0 : index
    %41 = vector.load %arg5[%c0_9, %c0_10] : memref<128x128xf32, #tpu.memory_space<vmem>>, vector<128x128xf32>
    tpu.vector_store %arg5[%c0_9, %c0_10], %40 {strides = array<i32>} : memref<128x128xf32, #tpu.memory_space<vmem>>, vector<128x128xf32>,
    return
  }
  func.func @transform_0(%arg0: i32) -> (i32, i32) {
    %c0_i32 = arith.constant 0 : i32
    %c0_i32_0 = arith.constant 0 : i32
    return %arg0, %c0_i32 : i32, i32
  }
  func.func @transform_1(%arg0: i32) -> (i32, i32) {
    %c0_i32 = arith.constant 0 : i32
    %c0_i32_0 = arith.constant 0 : i32
    %c0_i32_1 = arith.constant 0 : i32
    return %c0_i32, %c0_i32_0 : i32, i32
  }
  func.func @transform_2(%arg0: i32) -> (i32, i32) {
    %c0_i32 = arith.constant 0 : i32
    %c0_i32_0 = arith.constant 0 : i32
    %c0_i32_1 = arith.constant 0 : i32
    return %c0_i32, %c0_i32_0 : i32, i32
  }
  func.func @transform_3(%arg0: i32) -> (i32, i32) {
    %c0_i32 = arith.constant 0 : i32
    %c0_i32_0 = arith.constant 0 : i32
    %c0_i32_1 = arith.constant 0 : i32
    return %c0_i32, %c0_i32_0 : i32, i32
  }
  func.func @transform_4(%arg0: i32) -> (i32, i32) {
    %c0_i32 = arith.constant 0 : i32
    %c0_i32_0 = arith.constant 0 : i32
    return %arg0, %c0_i32 : i32, i32
  }
}

</mosaic_0001>

<bundles_post_ra>
// kernel: tpu_custom_call.1
= control target key start
LH: loop header
LB: loop body
LE: loop exit
PB: predicated region body
PF: predicated region fallthrough
CT: control target
= control target key end

     0   :  { %9 = vsyncpa [#allocation3], 0  ;;  %s2684_s0 = inlined_call_operand.hbm [shape: f32[256,128], index: 0, kind: input, shape index: {}, may-alias: {0,4}]   ;;  %s2685_s1 = inlined_call_operand.vmem [shape: s32[1,512], index: 1, kind: input, shape index: {}]   ;;  %s2686_s2 = inlined_call_operand.vmem [shape: s32[1,512], index: 2, kind: input, shape index: {}]   ;;  %s2687_s3 = inlined_call_operand.vmem [shape: f32[32,128], index: 3, kind: input, shape index: {}]   ;;  %s2688_s4 = inlined_call_operand.hbm [shape: f32[256,128], index: 4, kind: output, shape index: {}, may-alias: {0,4}]  }
   0x1   :  { %11 = vsyncpa [#allocation3 + $0x1], 0 }
   0x2   :  { %12 = vsyncpa [#allocation4], 0 }
   0x3   :  { %14 = vsyncpa [#allocation4 + $0x1], 0  ;;  %s1814_s15 = smov 0   ;;  %s1816_s16 = smov 0  }
   0x4   :  { %s1818_s17 = smov 0   ;;  %s1820_s18 = smov 0  }
   0x5 LB: > { %s1835_s19 = sadd.s32 4294967295, %s1779_s18   ;;  %s1518_s20 = sadd.s32 4294967294, %s1779_s18   ;;  %s1779_s18 = sphi %s1820_s18, %s2701_s18   ;;  %s1775_s17 = sphi %s1818_s17, %s2700_s17   ;;  %s1771_s16 = sphi %s1816_s16, %s2699_s16   ;;  %s1767_s15 = sphi %s1814_s15, %s2698_s15  }
   0x6   : > { %s1839_s21 = sadd.s32 1, %s1779_s18   ;;  %s27_s22 = sadd.s32 1, %s1775_s17 }
   0x7   : > { %s24_s23 = ssub.s32 %s1779_s18, %s1839_s21  ;;  %p34_p0 = scmp.ne.s32.totalorder %s1775_s17, %s1771_s16 }
   0x8   : > { %p25_p1 = scmp.eq.s32.totalorder %s24_s23, 0  ;;  %p35_p2 = scmp.eq.s32.totalorder %s1779_s18, 0 }
   0x9   : > { %p40_p3 = scmp.ne.s32.totalorder %s1771_s16, %s1767_s15  ;;  %p41_p4 = scmp.eq.s32.totalorder %s1835_s19, 0 }
   0xa   : > { %s1851_s24 = scalar_select %p25_p1, %s1775_s17, %s27_s22  }
   0xb   : > { %p1853_p5 = por %p35_p2, %p34_p0  ;;  %p1857_p6 = por %p41_p4, %p40_p3 }
   0xc   : > { %p127_p7 = scmp.eq.s32.totalorder %s1835_s19, 1  ;;  %p133_p8 = scmp.eq.s32.totalorder %s1518_s20, 1 }
   0xd   : > { %p1643_p10 = scmp.lt.s32.totalorder %s1779_s18, 2  ;;  %s162_s29 = sand.u32 1, %s1775_s17  }
   0xe   : > { %p1864_p11 = por %p127_p7, %p34_p0  ;;  %p1868_p12 = por %p133_p8, %p40_p3 }
   0xf   : > { %s1565_s30 = sshll.u32 %s1779_s18, 11  ;;  %s1521_s5 = sshll.u32 %s162_s29, 7 }
  0x10   : > { %s2692_s27 = scalar_select %p1864_p11, 1, 0 }
  0x11   : > { %s2693_s28 = scalar_select %p1868_p12, 1, 0 }
  0x12   : > { %s1877_s8 = scalar_lea.hbm %s2684_s0, %s1565_s30  ;;  %s166_s9 = scalar_lea.vmem [#allocation2], %s1521_s5 }
  0x13   : > { %s173_s10 = sshll.u32 %s166_s9, 4  ;;  %p1881_p13 = pnand %p1643_p10, %p1853_p5  ;;  %s1885_s10 = int_to_ptr.vmem [resolvable:$true] %s173_s10 }
  0x14   : > { %s1887_s12 = scalar_lea.sflag [#allocation3], %s162_s29  ;;  %s1683_s13 = scalar_lea.hbm %s1877_s8, 2048 }
  0x15   : > { %p1684_p0 = scmp.ne.s32.totalorder %s1877_s8, %s1683_s13  ;;  %p1685_p1 = pneg %p1881_p13 }
  0x16   : > { %s1688_s22 = scalar_lea.hbm %s2684_s0, 4096  ;;  %p1689_p4 = scmp.lt.u32.totalorder %s1877_s8, %s2684_s0 }
  0x17   : > { %p1686_p2 = pnand %p1685_p1, %p1684_p0  ;;  %p1690_p5 = scmp.lt.u32.totalorder %s1688_s22, %s1683_s13 }
  0x18   : > { %p1692_p8 = scmp.lt.u32.totalorder %s1683_s13, %s1877_s8 }
  0x19   : > { %p1687_p3 = pneg %p1686_p2  ;;  %p1691_p7 = por %p1690_p5, %p1689_p4 }
  0x1b   : > { %p1693_p10 = por %p1692_p8, %p1691_p7 }
  0x1d   : > { %p1694_p9 = pnand %p1693_p10, %p1687_p3 }
  0x1f   : > { %1697 = shalt.err (!%p1694_p9)
}
  0x20   : > { %s1698_s29 = scalar_lea.vmem %s1885_s10, 2048  ;;  %s1781_s30 = smov [#allocation2]  }
  0x21   : > { %p1699_p0 = scmp.ne.s32.totalorder %s1885_s10, %s1698_s29  ;;  %s1703_s5 = sshll.u32 %s1781_s30, 4  ;;  %s1704_s5 = int_to_ptr.vmem [resolvable:$false] %s1703_s5 }
  0x22   : > { %s1705_s6 = scalar_lea.vmem %s1704_s5, 4096  ;;  %p1706_p11 = scmp.lt.s32.totalorder %s1885_s10, %s1704_s5 }
  0x23   : > { %p1701_p2 = pnand %p1699_p0, %p1685_p1  ;;  %p1707_p4 = scmp.lt.s32.totalorder %s1705_s6, %s1698_s29 }
  0x25   : > { %p1702_p12 = pneg %p1701_p2  ;;  %p1708_p5 = por %p1707_p4, %p1706_p11 }
  0x27   : > { %p1709_p7 = pnand %p1708_p5, %p1702_p12 }
  0x29   : > { %1712 = shalt.err (!%p1709_p7)
}
  0x2a   : > { %s1782_s7 = smov 128   ;;  %s1783_s9 = smov 8  }
  0x2b   : > { %1638 = dma.hbm_to_vmem [thread:$0]  (!%p1881_p13), %s1877_s8, 2048, %s1885_s10, %s1887_s12, %s1782_s7, %s1782_s7, %s1783_s9  }
  0x2c   : > { %p1524_p9 = scmp.ge.s32.totalorder %s1779_s18, 1  ;;  %p181_p1 = scmp.lt.s32.totalorder %s1779_s18, 3 }
  0x2e   : > { %p182_p3 = pnand %p1524_p9, %p181_p1 }
  0x2f   : > { %s1918_s13 = sand.u32 (!%p182_p3), 1, %s1771_s16  }
  0x30   : > { %185 = sbr.rel (%p182_p3) target bundleno = 590 (0x24e), region = 36  ;;  %s1525_s14 = sshll.u32 (!%p182_p3), %s1918_s13, 7 }
  0x31   : > { %s188_s20 = scalar_lea.sflag (!%p182_p3), [#allocation3], %s1918_s13  ;;  %s1924_s22 = scalar_lea.vmem (!%p182_p3), [#allocation2], %s1525_s14 }
  0x37   : > { %1758 = dma.done.wait (%p1857_p6), %s188_s20, 2048  }
  0x38   : > { %1760 = vsyncadd (%p1857_p6), %s188_s20, 4294965248  ;;  %s1527_s8 = sshll.u32 %s1835_s19, 7  ;;  %v219_v0 = vlaneseq  ;;  %v254_v14 = vld [vmem:[%s2685_s1] sm:$0xf]  ;;  %v1784_v28 = vmov 0   ;;  %s2603_s20 = scalar_lea.vmem [#allocation5], %s1525_s14 }
  0x39   : > { %v1934_v2 = vstv %s1527_s8  ;;  %v253_v17 = vld [vmem:[%s2686_s2] sm:$0xf]  ;;  %s1566_s14 = sshll.u32 %s1835_s19, 11  ;;  %s1445_s8 = sshll.u32 %s2603_s20, 4  ;;  %s2638_s8 = int_to_ptr.vmem [resolvable:$true] %s1445_s8 }
  0x3a   : > { %v1932_v1 = vshrl.u32 %v219_v0, 7  ;;  %s2636_s11 = scalar_lea.hbm %s2688_s4, %s1566_s14  ;;  %s1432_s19 = scalar_lea.sflag [#allocation4], %s1918_s13 }
  0x3b   : > { %p2695_p11 = scmp.ne.s32.totalorder %s2692_s27, 0  ;;  %s1786_s12 = smov [#allocation5]  }
  0x3c   : > { %v221_v3 = vadd.s32 8, %v1932_v1  ;;  %v257_v4 = vsub.s32 0, %v1932_v1  ;;  %v261_v5 = vsub.s32 1, %v1932_v1  ;;  %v265_v6 = vsub.s32 2, %v1932_v1  ;;  %s1717_s23 = sshll.u32 %s1786_s12, 4  ;;  %s1718_s23 = int_to_ptr.vmem [resolvable:$false] %s1717_s23 }
  0x3d   : > { %v269_v7 = vsub.s32 3, %v1932_v1  ;;  %v229_v8 = vadd.s32 72, %v1932_v1  ;;  %v228_v9 = vadd.s32 64, %v1932_v1  ;;  %v1948_v11 = vadd.s32 %v1934_v2, %v1932_v1  ;;  %s1719_s25 = scalar_lea.vmem %s1718_s23, 4096  ;;  %p1720_p8 = scmp.lt.s32.totalorder %s2638_s8, %s1718_s23 }
  0x3e   : > { %v1944_v10 = vadd.s32 %v1934_v2, %v221_v3  ;;  %v1951_v12 = vadd.s32 80, %v1932_v1  ;;  %v1954_v13 = vadd.s32 16, %v1932_v1  ;;  %v1969_v18 = vadd.s32 88, %v1932_v1 }
  0x3f   : > { %v1960_v15 = vadd.s32 %v1934_v2, %v229_v8  ;;  %v1963_v16 = vadd.s32 %v1934_v2, %v228_v9  ;;  %v1972_v19 = vadd.s32 24, %v1932_v1  ;;  %v1974_v20 = vrot.slane %v254_v14, %v257_v4 }
  0x40   : > { %v1976_v21 = vrot.slane %v254_v14, %v261_v5  ;;  %v1978_v22 = vrot.slane %v254_v14, %v265_v6  ;;  %v1980_v23 = vrot.slane %v254_v14, %v269_v7  ;;  %v1982_v24 = vrot.slane %v253_v17, %v257_v4 }
  0x41   : > { %v1984_v25 = vrot.slane %v253_v17, %v261_v5  ;;  %v1986_v26 = vrot.slane %v253_v17, %v265_v6  ;;  %v1988_v27 = vrot.slane %v253_v17, %v269_v7  ;;  %vm659_vm0 = vcmp.eq.s32.totalorder %v1974_v20, %v1944_v10 }
  0x42   : > { %vm660_vm1 = vcmp.eq.s32.totalorder %v1976_v21, %v1944_v10  ;;  %vm661_vm2 = vcmp.eq.s32.totalorder %v1978_v22, %v1944_v10  ;;  %vm662_vm3 = vcmp.eq.s32.totalorder %v1980_v23, %v1944_v10  ;;  %v723_v29 = vsel %vm659_vm0, 1, %v1784_v28 }
  0x43   : > { %v724_v30 = vsel %vm660_vm1, 1, %v1784_v28  ;;  %v725_v31 = vsel %vm661_vm2, 1, %v1784_v28  ;;  %v726_v32 = vsel %vm662_vm3, 1, %v1784_v28  ;;  %vm655_vm4 = vcmp.eq.s32.totalorder %v1974_v20, %v1948_v11 }
  0x44   : > { %v798_v33 = vadd.s32 %v724_v30, %v723_v29  ;;  %vm656_vm5 = vcmp.eq.s32.totalorder %v1976_v21, %v1948_v11  ;;  %vm657_vm6 = vcmp.eq.s32.totalorder %v1978_v22, %v1948_v11  ;;  %vm658_vm7 = vcmp.eq.s32.totalorder %v1980_v23, %v1948_v11 }
  0x45   : > { %v719_v34 = vsel %vm655_vm4, 1, %v1784_v28  ;;  %v720_v35 = vsel %vm656_vm5, 1, %v1784_v28  ;;  %v721_v36 = vsel %vm657_vm6, 1, %v1784_v28  ;;  %v722_v38 = vsel %vm658_vm7, 1, %v1784_v28 }
  0x46   : > { %v799_v37 = vadd.s32 %v798_v33, %v725_v31  ;;  %v783_v39 = vadd.s32 %v720_v35, %v719_v34  ;;  %vm691_vm8 = vcmp.eq.s32.totalorder %v1974_v20, %v1960_v15  ;;  %vm692_vm9 = vcmp.eq.s32.totalorder %v1976_v21, %v1960_v15 }
  0x47   : > { %vm693_vm10 = vcmp.eq.s32.totalorder %v1978_v22, %v1960_v15  ;;  %vm694_vm11 = vcmp.eq.s32.totalorder %v1980_v23, %v1960_v15  ;;  %v755_v40 = vsel %vm691_vm8, 1, %v1784_v28  ;;  %v756_v43 = vsel %vm692_vm9, 1, %v1784_v28 }
  0x48   : > { %v2023_v41 = vadd.s32 %v799_v37, %v726_v32  ;;  %v784_v42 = vadd.s32 %v783_v39, %v721_v36  ;;  %v757_v44 = vsel %vm693_vm10, 1, %v1784_v28  ;;  %v758_v45 = vsel %vm694_vm11, 1, %v1784_v28 }
  0x49   : > { %v918_v46 = vadd.s32 %v756_v43, %v755_v40  ;;  %vm687_vm12 = vcmp.eq.s32.totalorder %v1974_v20, %v1963_v16  ;;  %vm688_vm13 = vcmp.eq.s32.totalorder %v1976_v21, %v1963_v16  ;;  %vm689_vm14 = vcmp.eq.s32.totalorder %v1978_v22, %v1963_v16 }
  0x4a   : > { %v802_v47 = vshrl.u32 %v2023_v41, 16  ;;  %v2033_v48 = vadd.s32 %v784_v42, %v722_v38  ;;  %vm690_vm15 = vcmp.eq.s32.totalorder %v1980_v23, %v1963_v16  ;;  %v751_v50 = vsel %vm687_vm12, 1, %v1784_v28 }
  0x4b   : > { %v919_v49 = vadd.s32 %v918_v46, %v757_v44  ;;  %v752_v51 = vsel %vm688_vm13, 1, %v1784_v28  ;;  %v753_v52 = vsel %vm689_vm14, 1, %v1784_v28  ;;  %v754_v55 = vsel %vm690_vm15, 1, %v1784_v28 }
  0x4c   : > { %v804_v53 = vcvt.s32.f32 %v802_v47  ;;  %v787_v54 = vshrl.u32 %v2033_v48, 16  ;;  %v903_v56 = vadd.s32 %v752_v51, %v751_v50  ;;  %vm303_vm0 = vcmp.eq.s32.totalorder %v1982_v24, %v1963_v16 }
  0x4d   : > { %v2044_v57 = vadd.s32 %v919_v49, %v758_v45  ;;  %vm304_vm1 = vcmp.eq.s32.totalorder %v1984_v25, %v1963_v16  ;;  %vm305_vm2 = vcmp.eq.s32.totalorder %v1986_v26, %v1963_v16  ;;  %vm306_vm3 = vcmp.eq.s32.totalorder %v1988_v27, %v1963_v16 }
  0x4e   : > { %807 = vadd.xlane.f32.xlu1 %v804_v53  ;;  %v789_v58 = vcvt.s32.f32 %v787_v54  ;;  %v904_v59 = vadd.s32 %v903_v56, %v753_v52  ;;  %v367_v60 = vsel %vm303_vm0, 1, %v1784_v28  ;;  %v368_v62 = vsel %vm304_vm1, 1, %v1784_v28 }
  0x4f   : > { %v922_v61 = vshrl.u32 %v2044_v57, 16  ;;  %v369_v63 = vsel %vm305_vm2, 1, %v1784_v28  ;;  %v370_v3 = vsel %vm306_vm3, 1, %v1784_v28  ;;  %v519_v5 = vadd.s32 %v368_v62, %v367_v60 }
  0x50   : > { %792 = vadd.xlane.f32.xlu0 %v789_v58  ;;  %v905_v4 = vadd.s32 %v904_v59, %v754_v55  ;;  %vm271_vm4 = vcmp.eq.s32.totalorder %v1982_v24, %v1948_v11  ;;  %vm272_vm5 = vcmp.eq.s32.totalorder %v1984_v25, %v1948_v11  ;;  %vm273_vm6 = vcmp.eq.s32.totalorder %v1986_v26, %v1948_v11 }
  0x51   : > { %v924_v6 = vcvt.s32.f32 %v922_v61  ;;  %vm274_vm7 = vcmp.eq.s32.totalorder %v1988_v27, %v1948_v11  ;;  %v335_v7 = vsel %vm271_vm4, 1, %v1784_v28  ;;  %v520_v9 = vadd.s32 %v519_v5, %v369_v63 }
  0x52   : > { %v907_v8 = vshrl.u32 %v905_v4, 16  ;;  %v336_v14 = vsel %vm272_vm5, 1, %v1784_v28  ;;  %v337_v16 = vsel %vm273_vm6, 1, %v1784_v28  ;;  %v338_v17 = vsel %vm274_vm7, 1, %v1784_v28 }
  0x53   : > { %927 = vadd.xlane.f32.xlu1 %v924_v6  ;;  %v399_v29 = vadd.s32 %v336_v14, %v335_v7  ;;  %v906_v30 = vand.u32 65535, %v905_v4  ;;  %v2072_v31 = vadd.s32 96, %v1932_v1  ;;  %v521_v33 = vadd.s32 %v520_v9, %v370_v3 }
  0x54   : > { %v909_v32 = vcvt.s32.f32 %v907_v8  ;;  %vm307_vm8 = vcmp.eq.s32.totalorder %v1982_v24, %v1960_v15  ;;  %vm308_vm9 = vcmp.eq.s32.totalorder %v1984_v25, %v1960_v15  ;;  %v786_v35 = vand.u32 65535, %v2033_v48 }
  0x55   : > { %v400_v11 = vadd.s32 %v399_v29, %v337_v16  ;;  %v908_v34 = vcvt.s32.f32 %v906_v30  ;;  %vm309_vm10 = vcmp.eq.s32.totalorder %v1986_v26, %v1960_v15  ;;  %v523_v36 = vshrl.u32 %v521_v33, 16 }
  0x56   : > { %912 = vadd.xlane.f32.xlu0 %v909_v32  ;;  %vm310_vm11 = vcmp.eq.s32.totalorder %v1988_v27, %v1960_v15  ;;  %v371_v37 = vsel %vm307_vm8, 1, %v1784_v28  ;;  %v372_v38 = vsel %vm308_vm9, 1, %v1784_v28  ;;  %v373_v40 = vsel %vm309_vm10, 1, %v1784_v28 }
  0x57   : > { %v401_v39 = vadd.s32 %v400_v11, %v338_v17  ;;  %v374_v42 = vsel %vm310_vm11, 1, %v1784_v28  ;;  %v534_v43 = vadd.s32 %v372_v38, %v371_v37  ;;  %v525_v44 = vcvt.s32.f32 %v523_v36 }
  0x58   : > { %vm275_vm12 = vcmp.eq.s32.totalorder %v1982_v24, %v1944_v10  ;;  %vm276_vm13 = vcmp.eq.s32.totalorder %v1984_v25, %v1944_v10  ;;  %vm277_vm14 = vcmp.eq.s32.totalorder %v1986_v26, %v1944_v10  ;;  %vm278_vm15 = vcmp.eq.s32.totalorder %v1988_v27, %v1944_v10 }
  0x59   : > { %v403_v15 = vshrl.u32 %v401_v39, 16  ;;  %v535_v45 = vadd.s32 %v534_v43, %v373_v40  ;;  %v339_v46 = vsel %vm275_vm12, 1, %v1784_v28  ;;  %528 = vadd.xlane.f32.xlu1 %v525_v44  ;;  %v788_v47 = vcvt.s32.f32 %v786_v35 }
  0x5a   : > { %v340_v48 = vsel %vm276_vm13, 1, %v1784_v28  ;;  %v341_v49 = vsel %vm277_vm14, 1, %v1784_v28  ;;  %v921_v50 = vand.u32 65535, %v2044_v57  ;;  %v801_v54 = vand.u32 65535, %v2023_v41 }
  0x5b   : > { %v405_v51 = vcvt.s32.f32 %v403_v15  ;;  %v536_v52 = vadd.s32 %v535_v45, %v374_v42  ;;  %v414_v53 = vadd.s32 %v340_v48, %v339_v46  ;;  %v342_v55 = vsel %vm278_vm15, 1, %v1784_v28 }
  0x5c   : > { %v923_v56 = vcvt.s32.f32 %v921_v50  ;;  %v522_v58 = vand.u32 65535, %v521_v33  ;;  %v2103_v10 = vadd.s32 %v1934_v2, %v1951_v12  ;;  %v402_v61 = vand.u32 65535, %v401_v39 }
  0x5d   : > { %408 = vadd.xlane.f32.xlu0 %v405_v51  ;;  %v538_v59 = vshrl.u32 %v536_v52, 16  ;;  %v415_v60 = vadd.s32 %v414_v53, %v341_v49  ;;  %v2107_v57 = vadd.s32 %v1934_v2, %v1954_v13  ;;  %910 = vadd.xlane.f32.xlu1 %v908_v34  ;;  %v803_v62 = vcvt.s32.f32 %v801_v54 }
  0x5e   : > { %v524_v63 = vcvt.s32.f32 %v522_v58  ;;  %vm695_vm0 = vcmp.eq.s32.totalorder %v1974_v20, %v2103_v10  ;;  %vm696_vm1 = vcmp.eq.s32.totalorder %v1976_v21, %v2103_v10  ;;  %vm697_vm2 = vcmp.eq.s32.totalorder %v1978_v22, %v2103_v10 }
  0x5f   : > { %v540_v41 = vcvt.s32.f32 %v538_v59  ;;  %v2113_v12 = vadd.s32 %v415_v60, %v342_v55  ;;  %vm698_vm3 = vcmp.eq.s32.totalorder %v1980_v23, %v2103_v10  ;;  %v759_v13 = vsel %vm695_vm0, 1, %v1784_v28 }
  0x60   : > { %v760_v3 = vsel %vm696_vm1, 1, %v1784_v28  ;;  %v761_v4 = vsel %vm697_vm2, 1, %v1784_v28  ;;  %v762_v5 = vsel %vm698_vm3, 1, %v1784_v28  ;;  %vm663_vm4 = vcmp.eq.s32.totalorder %v1974_v20, %v2107_v57 }
  0x61   : > { %790 = vadd.xlane.f32.xlu0 %v788_v47  ;;  %v418_v6 = vshrl.u32 %v2113_v12, 16  ;;  %v933_v7 = vadd.s32 %v760_v3, %v759_v13  ;;  %vm664_vm5 = vcmp.eq.s32.totalorder %v1976_v21, %v2107_v57  ;;  %543 = vadd.xlane.f32.xlu1 %v540_v41  ;;  %vm665_vm6 = vcmp.eq.s32.totalorder %v1978_v22, %v2107_v57 }
  0x62   : > { %vm666_vm7 = vcmp.eq.s32.totalorder %v1980_v23, %v2107_v57  ;;  %v727_v8 = vsel %vm663_vm4, 1, %v1784_v28  ;;  %v728_v9 = vsel %vm664_vm5, 1, %v1784_v28  ;;  %v404_v16 = vcvt.s32.f32 %v402_v61 }
  0x63   : > { %v420_v14 = vcvt.s32.f32 %v418_v6  ;;  %v934_v17 = vadd.s32 %v933_v7, %v761_v4  ;;  %v729_v29 = vsel %vm665_vm6, 1, %v1784_v28  ;;  %v730_v30 = vsel %vm666_vm7, 1, %v1784_v28 }
  0x64   : > { %v813_v32 = vadd.s32 %v728_v9, %v727_v8  ;;  %v537_v33 = vand.u32 65535, %v536_v52  ;;  %v2138_v11 = vadd.s32 %v1934_v2, %v1969_v18  ;;  %v417_v35 = vand.u32 65535, %v2113_v12 }
  0x65   : > { %423 = vadd.xlane.f32.xlu0 %v420_v14  ;;  %v2140_v34 = vadd.s32 %v934_v17, %v762_v5  ;;  %v2145_v36 = vadd.s32 %v1934_v2, %v1972_v19  ;;  %vm311_vm8 = vcmp.eq.s32.totalorder %v1982_v24, %v2103_v10  ;;  %925 = vadd.xlane.f32.xlu1 %v923_v56 }
  0x66   : > { %v814_v37 = vadd.s32 %v813_v32, %v729_v29  ;;  %v539_v38 = vcvt.s32.f32 %v537_v33  ;;  %vm699_vm9 = vcmp.eq.s32.totalorder %v1974_v20, %v2138_v11  ;;  %vm312_vm10 = vcmp.eq.s32.totalorder %v1984_v25, %v2103_v10 }
  0x67   : > { %v937_v18 = vshrl.u32 %v2140_v34, 16  ;;  %vm700_vm11 = vcmp.eq.s32.totalorder %v1976_v21, %v2138_v11  ;;  %vm701_vm12 = vcmp.eq.s32.totalorder %v1978_v22, %v2138_v11  ;;  %vm702_vm13 = vcmp.eq.s32.totalorder %v1980_v23, %v2138_v11 }
  0x68   : > { %v2160_v19 = vadd.s32 %v814_v37, %v730_v30  ;;  %v763_v39 = vsel %vm699_vm9, 1, %v1784_v28  ;;  %v764_v40 = vsel %vm700_vm11, 1, %v1784_v28  ;;  %v765_v42 = vsel %vm701_vm12, 1, %v1784_v28 }
  0x69   : > { %805 = vadd.xlane.f32.xlu0 %v803_v62  ;;  %v939_v43 = vcvt.s32.f32 %v937_v18  ;;  %v766_v44 = vsel %vm702_vm13, 1, %v1784_v28  ;;  %v948_v15 = vadd.s32 %v764_v40, %v763_v39  ;;  %vm667_vm14 = vcmp.eq.s32.totalorder %v1974_v20, %v2145_v36  ;;  %526 = vadd.xlane.f32.xlu1 %v524_v63 }
  0x6a   : > { %v817_v45 = vshrl.u32 %v2160_v19, 16  ;;  %vm668_vm15 = vcmp.eq.s32.totalorder %v1976_v21, %v2145_v36  ;;  %vm669_vm0 = vcmp.eq.s32.totalorder %v1978_v22, %v2145_v36  ;;  %vm670_vm1 = vcmp.eq.s32.totalorder %v1980_v23, %v2145_v36 }
  0x6b   : > { %v949_v46 = vadd.s32 %v948_v15, %v765_v42  ;;  %v731_v47 = vsel %vm667_vm14, 1, %v1784_v28  ;;  %v732_v48 = vsel %vm668_vm15, 1, %v1784_v28  ;;  %v733_v49 = vsel %vm669_vm0, 1, %v1784_v28 }
  0x6c   : > { %v819_v50 = vcvt.s32.f32 %v817_v45  ;;  %v734_v51 = vsel %vm670_vm1, 1, %v1784_v28  ;;  %v828_v52 = vadd.s32 %v732_v48, %v731_v47  ;;  %vm313_vm2 = vcmp.eq.s32.totalorder %v1986_v26, %v2103_v10 }
  0x6d   : > { %406 = vadd.xlane.f32.xlu0 %v404_v16  ;;  %v2181_v53 = vadd.s32 %v949_v46, %v766_v44  ;;  %vm314_vm3 = vcmp.eq.s32.totalorder %v1988_v27, %v2103_v10  ;;  %v375_v54 = vsel %vm311_vm8, 1, %v1784_v28  ;;  %v376_v55 = vsel %vm312_vm10, 1, %v1784_v28  ;;  %942 = vadd.xlane.f32.xlu1 %v939_v43 }
  0x6e   : > { %v829_v56 = vadd.s32 %v828_v52, %v733_v49  ;;  %v377_v58 = vsel %vm313_vm2, 1, %v1784_v28  ;;  %v378_v59 = vsel %vm314_vm3, 1, %v1784_v28  ;;  %v549_v60 = vadd.s32 %v376_v55, %v375_v54 }
  0x6f   : > { %v952_v61 = vshrl.u32 %v2181_v53, 16  ;;  %vm279_vm4 = vcmp.eq.s32.totalorder %v1982_v24, %v2107_v57  ;;  %vm280_vm5 = vcmp.eq.s32.totalorder %v1984_v25, %v2107_v57  ;;  %vm281_vm6 = vcmp.eq.s32.totalorder %v1986_v26, %v2107_v57 }
  0x70   : > { %v830_v10 = vadd.s32 %v829_v56, %v734_v51  ;;  %v550_v62 = vadd.s32 %v549_v60, %v377_v58  ;;  %vm282_vm7 = vcmp.eq.s32.totalorder %v1988_v27, %v2107_v57  ;;  %v343_v63 = vsel %vm279_vm4, 1, %v1784_v28 }
  0x71   : > { %822 = vadd.xlane.f32.xlu0 %v819_v50  ;;  %v419_v41 = vcvt.s32.f32 %v417_v35  ;;  %v954_v12 = vcvt.s32.f32 %v952_v61  ;;  %v344_v13 = vsel %vm280_vm5, 1, %v1784_v28  ;;  %v345_v3 = vsel %vm281_vm6, 1, %v1784_v28  ;;  %541 = vadd.xlane.f32.xlu1 %v539_v38 }
  0x72   : > { %v832_v4 = vshrl.u32 %v830_v10, 16  ;;  %v551_v5 = vadd.s32 %v550_v62, %v378_v59  ;;  %v429_v6 = vadd.s32 %v344_v13, %v343_v63  ;;  %v936_v7 = vand.u32 65535, %v2140_v34 }
  0x73   : > { %v346_v8 = vsel %vm282_vm7, 1, %v1784_v28  ;;  %vm315_vm8 = vcmp.eq.s32.totalorder %v1982_v24, %v2138_v11  ;;  %vm316_vm9 = vcmp.eq.s32.totalorder %v1984_v25, %v2138_v11  ;;  %vm317_vm10 = vcmp.eq.s32.totalorder %v1986_v26, %v2138_v11 }
  0x74   : > { %v834_v57 = vcvt.s32.f32 %v832_v4  ;;  %v553_v9 = vshrl.u32 %v551_v5, 16  ;;  %v430_v14 = vadd.s32 %v429_v6, %v345_v3  ;;  %v816_v16 = vand.u32 65535, %v2160_v19 }
  0x75   : > { %421 = vadd.xlane.f32.xlu0 %v419_v41  ;;  %v938_v17 = vcvt.s32.f32 %v936_v7  ;;  %vm318_vm11 = vcmp.eq.s32.totalorder %v1988_v27, %v2138_v11  ;;  %v379_v29 = vsel %vm315_vm8, 1, %v1784_v28  ;;  %v380_v30 = vsel %vm316_vm9, 1, %v1784_v28  ;;  %957 = vadd.xlane.f32.xlu1 %v954_v12 }
  0x76   : > { %v555_v32 = vcvt.s32.f32 %v553_v9  ;;  %v431_v33 = vadd.s32 %v430_v14, %v346_v8  ;;  %v381_v34 = vsel %vm317_vm10, 1, %v1784_v28  ;;  %v382_v35 = vsel %vm318_vm11, 1, %v1784_v28 }
  0x77   : > { %v564_v37 = vadd.s32 %v380_v30, %v379_v29  ;;  %vm283_vm12 = vcmp.eq.s32.totalorder %v1982_v24, %v2145_v36  ;;  %vm284_vm13 = vcmp.eq.s32.totalorder %v1984_v25, %v2145_v36  ;;  %vm285_vm14 = vcmp.eq.s32.totalorder %v1986_v26, %v2145_v36 }
  0x78   : > { %v433_v11 = vshrl.u32 %v431_v33, 16  ;;  %vm286_vm15 = vcmp.eq.s32.totalorder %v1988_v27, %v2145_v36  ;;  %v347_v38 = vsel %vm283_vm12, 1, %v1784_v28  ;;  %v348_v18 = vsel %vm284_vm13, 1, %v1784_v28 }
  0x79   : > { %837 = vadd.xlane.f32.xlu0 %v834_v57  ;;  %v565_v19 = vadd.s32 %v564_v37, %v381_v34  ;;  %v349_v39 = vsel %vm285_vm14, 1, %v1784_v28  ;;  %v350_v40 = vsel %vm286_vm15, 1, %v1784_v28  ;;  %v444_v42 = vadd.s32 %v348_v18, %v347_v38  ;;  %558 = vadd.xlane.f32.xlu1 %v555_v32 }
  0x7a   : > { %v435_v43 = vcvt.s32.f32 %v433_v11  ;;  %v951_v44 = vand.u32 65535, %v2181_v53  ;;  %v831_v15 = vand.u32 65535, %v830_v10  ;;  %v552_v45 = vand.u32 65535, %v551_v5 }
  0x7b   : > { %v818_v46 = vcvt.s32.f32 %v816_v16  ;;  %v566_v47 = vadd.s32 %v565_v19, %v382_v35  ;;  %v445_v36 = vadd.s32 %v444_v42, %v349_v39  ;;  %v2237_v48 = vadd.s32 %v1934_v2, %v2072_v31 }
  0x7c   : > { %v953_v49 = vcvt.s32.f32 %v951_v44  ;;  %v833_v50 = vcvt.s32.f32 %v831_v15  ;;  %v432_v51 = vand.u32 65535, %v431_v33  ;;  %v224_v52 = vadd.s32 32, %v1932_v1 }
  0x7d   : > { %438 = vadd.xlane.f32.xlu0 %v435_v43  ;;  %v568_v54 = vshrl.u32 %v566_v47, 16  ;;  %v2240_v55 = vadd.s32 %v445_v36, %v350_v40  ;;  %v554_v56 = vcvt.s32.f32 %v552_v45  ;;  %vm703_vm0 = vcmp.eq.s32.totalorder %v1974_v20, %v2237_v48  ;;  %940 = vadd.xlane.f32.xlu1 %v938_v17 }
  0x7e   : > { %vm704_vm1 = vcmp.eq.s32.totalorder %v1976_v21, %v2237_v48  ;;  %vm705_vm2 = vcmp.eq.s32.totalorder %v1978_v22, %v2237_v48  ;;  %vm706_vm3 = vcmp.eq.s32.totalorder %v1980_v23, %v2237_v48  ;;  %v767_v31 = vsel %vm703_vm0, 1, %v1784_v28 }
  0x7f   : > { %v570_v53 = vcvt.s32.f32 %v568_v54  ;;  %v448_v58 = vshrl.u32 %v2240_v55, 16  ;;  %v768_v59 = vsel %vm704_vm1, 1, %v1784_v28  ;;  %v769_v60 = vsel %vm705_vm2, 1, %v1784_v28 }
  0x80   : > { %v434_v61 = vcvt.s32.f32 %v432_v51  ;;  %v770_v10 = vsel %vm706_vm3, 1, %v1784_v28  ;;  %v963_v62 = vadd.s32 %v768_v59, %v767_v31  ;;  %v2256_v63 = vadd.s32 %v1934_v2, %v224_v52 }
  0x81   : > { %820 = vadd.xlane.f32.xlu0 %v818_v46  ;;  %v450_v41 = vcvt.s32.f32 %v448_v58  ;;  %v567_v12 = vand.u32 65535, %v566_v47  ;;  %v233_v13 = vadd.s32 104, %v1932_v1  ;;  %v225_v3 = vadd.s32 40, %v1932_v1  ;;  %573 = vadd.xlane.f32.xlu1 %v570_v53 }
  0x82   : > { %v964_v4 = vadd.s32 %v963_v62, %v769_v60  ;;  %vm671_vm4 = vcmp.eq.s32.totalorder %v1974_v20, %v2256_v63  ;;  %vm672_vm5 = vcmp.eq.s32.totalorder %v1976_v21, %v2256_v63  ;;  %vm673_vm6 = vcmp.eq.s32.totalorder %v1978_v22, %v2256_v63 }
  0x83   : > { %vm674_vm7 = vcmp.eq.s32.totalorder %v1980_v23, %v2256_v63  ;;  %v735_v5 = vsel %vm671_vm4, 1, %v1784_v28  ;;  %v736_v6 = vsel %vm672_vm5, 1, %v1784_v28  ;;  %v737_v7 = vsel %vm673_vm6, 1, %v1784_v28 }
  0x84   : > { %v2271_v8 = vadd.s32 %v964_v4, %v770_v10  ;;  %v738_v57 = vsel %vm674_vm7, 1, %v1784_v28  ;;  %v843_v9 = vadd.s32 %v736_v6, %v735_v5  ;;  %v447_v14 = vand.u32 65535, %v2240_v55 }
  0x85   : > { %453 = vadd.xlane.f32.xlu0 %v450_v41  ;;  %v569_v16 = vcvt.s32.f32 %v567_v12  ;;  %v2276_v17 = vadd.s32 %v1934_v2, %v233_v13  ;;  %v2279_v29 = vadd.s32 %v1934_v2, %v225_v3  ;;  %vm319_vm8 = vcmp.eq.s32.totalorder %v1982_v24, %v2237_v48  ;;  %955 = vadd.xlane.f32.xlu1 %v953_v49 }
  0x86   : > { %v967_v30 = vshrl.u32 %v2271_v8, 16  ;;  %v844_v32 = vadd.s32 %v843_v9, %v737_v7  ;;  %vm320_vm9 = vcmp.eq.s32.totalorder %v1984_v25, %v2237_v48  ;;  %vm321_vm10 = vcmp.eq.s32.totalorder %v1986_v26, %v2237_v48 }
  0x87   : > { %vm707_vm11 = vcmp.eq.s32.totalorder %v1974_v20, %v2276_v17  ;;  %vm708_vm12 = vcmp.eq.s32.totalorder %v1976_v21, %v2276_v17  ;;  %vm709_vm13 = vcmp.eq.s32.totalorder %v1978_v22, %v2276_v17  ;;  %vm710_vm14 = vcmp.eq.s32.totalorder %v1980_v23, %v2276_v17 }
  0x88   : > { %v969_v33 = vcvt.s32.f32 %v967_v30  ;;  %v2296_v34 = vadd.s32 %v844_v32, %v738_v57  ;;  %v771_v35 = vsel %vm707_vm11, 1, %v1784_v28  ;;  %v772_v37 = vsel %vm708_vm12, 1, %v1784_v28 }
  0x89   : > { %835 = vadd.xlane.f32.xlu0 %v833_v50  ;;  %v773_v11 = vsel %vm709_vm13, 1, %v1784_v28  ;;  %v774_v38 = vsel %vm710_vm14, 1, %v1784_v28  ;;  %v978_v18 = vadd.s32 %v772_v37, %v771_v35  ;;  %vm675_vm15 = vcmp.eq.s32.totalorder %v1974_v20, %v2279_v29  ;;  %556 = vadd.xlane.f32.xlu1 %v554_v56 }
  0x8a   : > { %v847_v19 = vshrl.u32 %v2296_v34, 16  ;;  %vm676_vm0 = vcmp.eq.s32.totalorder %v1976_v21, %v2279_v29  ;;  %vm677_vm1 = vcmp.eq.s32.totalorder %v1978_v22, %v2279_v29  ;;  %vm678_vm2 = vcmp.eq.s32.totalorder %v1980_v23, %v2279_v29 }
  0x8b   : > { %v979_v39 = vadd.s32 %v978_v18, %v773_v11  ;;  %v739_v40 = vsel %vm675_vm15, 1, %v1784_v28  ;;  %v740_v42 = vsel %vm676_vm0, 1, %v1784_v28  ;;  %v741_v43 = vsel %vm677_vm1, 1, %v1784_v28 }
  0x8c   : > { %v849_v44 = vcvt.s32.f32 %v847_v19  ;;  %v742_v15 = vsel %vm678_vm2, 1, %v1784_v28  ;;  %v858_v45 = vadd.s32 %v740_v42, %v739_v40  ;;  %vm322_vm3 = vcmp.eq.s32.totalorder %v1988_v27, %v2237_v48 }
  0x8d   : > { %436 = vadd.xlane.f32.xlu0 %v434_v61  ;;  %v2317_v46 = vadd.s32 %v979_v39, %v774_v38  ;;  %v383_v47 = vsel %vm319_vm8, 1, %v1784_v28  ;;  %v384_v36 = vsel %vm320_vm9, 1, %v1784_v28  ;;  %v385_v49 = vsel %vm321_vm10, 1, %v1784_v28  ;;  %972 = vadd.xlane.f32.xlu1 %v969_v33 }
  0x8e   : > { %v859_v50 = vadd.s32 %v858_v45, %v741_v43  ;;  %v386_v51 = vsel %vm322_vm3, 1, %v1784_v28  ;;  %v579_v52 = vadd.s32 %v384_v36, %v383_v47  ;;  %vm287_vm4 = vcmp.eq.s32.totalorder %v1982_v24, %v2256_v63 }
  0x8f   : > { %v982_v54 = vshrl.u32 %v2317_v46, 16  ;;  %vm288_vm5 = vcmp.eq.s32.totalorder %v1984_v25, %v2256_v63  ;;  %vm289_vm6 = vcmp.eq.s32.totalorder %v1986_v26, %v2256_v63  ;;  %vm290_vm7 = vcmp.eq.s32.totalorder %v1988_v27, %v2256_v63 }
  0x90   : > { %v860_v48 = vadd.s32 %v859_v50, %v742_v15  ;;  %v580_v55 = vadd.s32 %v579_v52, %v385_v49  ;;  %v351_v56 = vsel %vm287_vm4, 1, %v1784_v28  ;;  %v352_v31 = vsel %vm288_vm5, 1, %v1784_v28 }
  0x91   : > { %852 = vadd.xlane.f32.xlu0 %v849_v44  ;;  %v449_v53 = vcvt.s32.f32 %v447_v14  ;;  %v984_v58 = vcvt.s32.f32 %v982_v54  ;;  %v353_v59 = vsel %vm289_vm6, 1, %v1784_v28  ;;  %v459_v60 = vadd.s32 %v352_v31, %v351_v56  ;;  %571 = vadd.xlane.f32.xlu1 %v569_v16 }
  0x92   : > { %v862_v61 = vshrl.u32 %v860_v48, 16  ;;  %v581_v10 = vadd.s32 %v580_v55, %v386_v51  ;;  %v354_v62 = vsel %vm290_vm7, 1, %v1784_v28  ;;  %v966_v41 = vand.u32 65535, %v2271_v8 }
  0x93   : > { %v460_v63 = vadd.s32 %v459_v60, %v353_v59  ;;  %vm323_vm8 = vcmp.eq.s32.totalorder %v1982_v24, %v2276_v17  ;;  %vm324_vm9 = vcmp.eq.s32.totalorder %v1984_v25, %v2276_v17  ;;  %vm325_vm10 = vcmp.eq.s32.totalorder %v1986_v26, %v2276_v17 }
  0x94   : > { %v864_v12 = vcvt.s32.f32 %v862_v61  ;;  %v583_v13 = vshrl.u32 %v581_v10, 16  ;;  %v968_v3 = vcvt.s32.f32 %v966_v41  ;;  %v846_v4 = vand.u32 65535, %v2296_v34 }
  0x95   : > { %451 = vadd.xlane.f32.xlu0 %v449_v53  ;;  %v2353_v5 = vadd.s32 %v460_v63, %v354_v62  ;;  %vm326_vm11 = vcmp.eq.s32.totalorder %v1988_v27, %v2276_v17  ;;  %v387_v6 = vsel %vm323_vm8, 1, %v1784_v28  ;;  %v388_v7 = vsel %vm324_vm9, 1, %v1784_v28  ;;  %987 = vadd.xlane.f32.xlu1 %v984_v58 }
  0x96   : > { %v585_v8 = vcvt.s32.f32 %v583_v13  ;;  %v389_v57 = vsel %vm325_vm10, 1, %v1784_v28  ;;  %v390_v9 = vsel %vm326_vm11, 1, %v1784_v28  ;;  %v594_v14 = vadd.s32 %v388_v7, %v387_v6 }
  0x97   : > { %v463_v16 = vshrl.u32 %v2353_v5, 16  ;;  %vm291_vm12 = vcmp.eq.s32.totalorder %v1982_v24, %v2279_v29  ;;  %vm292_vm13 = vcmp.eq.s32.totalorder %v1984_v25, %v2279_v29  ;;  %vm293_vm14 = vcmp.eq.s32.totalorder %v1986_v26, %v2279_v29 }
  0x98   : > { %v595_v17 = vadd.s32 %v594_v14, %v389_v57  ;;  %vm294_vm15 = vcmp.eq.s32.totalorder %v1988_v27, %v2279_v29  ;;  %v355_v30 = vsel %vm291_vm12, 1, %v1784_v28  ;;  %v356_v32 = vsel %vm292_vm13, 1, %v1784_v28 }
  0x99   : > { %867 = vadd.xlane.f32.xlu0 %v864_v12  ;;  %v465_v33 = vcvt.s32.f32 %v463_v16  ;;  %v357_v34 = vsel %vm293_vm14, 1, %v1784_v28  ;;  %v358_v35 = vsel %vm294_vm15, 1, %v1784_v28  ;;  %v474_v37 = vadd.s32 %v356_v32, %v355_v30  ;;  %588 = vadd.xlane.f32.xlu1 %v585_v8 }
  0x9a   : > { %v596_v11 = vadd.s32 %v595_v17, %v390_v9  ;;  %v981_v38 = vand.u32 65535, %v2317_v46  ;;  %v861_v18 = vand.u32 65535, %v860_v48  ;;  %v582_v19 = vand.u32 65535, %v581_v10 }
  0x9b   : > { %v848_v39 = vcvt.s32.f32 %v846_v4  ;;  %v475_v40 = vadd.s32 %v474_v37, %v357_v34  ;;  %v234_v29 = vadd.s32 112, %v1932_v1  ;;  %v226_v42 = vadd.s32 48, %v1932_v1 }
  0x9c   : > { %v598_v43 = vshrl.u32 %v596_v11, 16  ;;  %v983_v44 = vcvt.s32.f32 %v981_v38  ;;  %v863_v15 = vcvt.s32.f32 %v861_v18  ;;  %v462_v45 = vand.u32 65535, %v2353_v5 }
  0x9d   : > { %468 = vadd.xlane.f32.xlu0 %v465_v33  ;;  %v2378_v47 = vadd.s32 %v475_v40, %v358_v35  ;;  %v584_v36 = vcvt.s32.f32 %v582_v19  ;;  %v2381_v49 = vadd.s32 %v1934_v2, %v234_v29  ;;  %v2384_v46 = vadd.s32 %v1934_v2, %v226_v42  ;;  %970 = vadd.xlane.f32.xlu1 %v968_v3 }
  0x9e   : > { %v600_v50 = vcvt.s32.f32 %v598_v43  ;;  %v597_v51 = vand.u32 65535, %v596_v11  ;;  %v235_v52 = vadd.s32 120, %v1932_v1  ;;  %v227_v54 = vadd.s32 56, %v1932_v1 }
  0x9f   : > { %v478_v48 = vshrl.u32 %v2378_v47, 16  ;;  %vm711_vm0 = vcmp.eq.s32.totalorder %v1974_v20, %v2381_v49  ;;  %vm712_vm1 = vcmp.eq.s32.totalorder %v1976_v21, %v2381_v49  ;;  %vm713_vm2 = vcmp.eq.s32.totalorder %v1978_v22, %v2381_v49 }
  0xa0   : > { %vm714_vm3 = vcmp.eq.s32.totalorder %v1980_v23, %v2381_v49  ;;  %v775_v55 = vsel %vm711_vm0, 1, %v1784_v28  ;;  %v776_v56 = vsel %vm712_vm1, 1, %v1784_v28  ;;  %v777_v1 = vsel %vm713_vm2, 1, %v1784_v28 }
  0xa1   : > { %850 = vadd.xlane.f32.xlu0 %v848_v39  ;;  %v480_v31 = vcvt.s32.f32 %v478_v48  ;;  %v778_v53 = vsel %vm714_vm3, 1, %v1784_v28  ;;  %v993_v58 = vadd.s32 %v776_v56, %v775_v55  ;;  %vm679_vm4 = vcmp.eq.s32.totalorder %v1974_v20, %v2384_v46  ;;  %603 = vadd.xlane.f32.xlu1 %v600_v50 }
  0xa2   : > { %vm680_vm5 = vcmp.eq.s32.totalorder %v1976_v21, %v2384_v46  ;;  %vm681_vm6 = vcmp.eq.s32.totalorder %v1978_v22, %v2384_v46  ;;  %vm682_vm7 = vcmp.eq.s32.totalorder %v1980_v23, %v2384_v46  ;;  %v743_v59 = vsel %vm679_vm4, 1, %v1784_v28 }
  0xa3   : > { %v464_v60 = vcvt.s32.f32 %v462_v45  ;;  %v994_v61 = vadd.s32 %v993_v58, %v777_v1  ;;  %v744_v10 = vsel %vm680_vm5, 1, %v1784_v28  ;;  %v745_v62 = vsel %vm681_vm6, 1, %v1784_v28 }
  0xa4   : > { %v746_v41 = vsel %vm682_vm7, 1, %v1784_v28  ;;  %v873_v63 = vadd.s32 %v744_v10, %v743_v59  ;;  %v599_v12 = vcvt.s32.f32 %v597_v51  ;;  %v2414_v13 = vadd.s32 %v1934_v2, %v235_v52 }
  0xa5   : > { %483 = vadd.xlane.f32.xlu0 %v480_v31  ;;  %v2416_v3 = vadd.s32 %v994_v61, %v778_v53  ;;  %v477_v4 = vand.u32 65535, %v2378_v47  ;;  %v2420_v5 = vadd.s32 %v1934_v2, %v227_v54  ;;  %vm327_vm8 = vcmp.eq.s32.totalorder %v1982_v24, %v2381_v49  ;;  %985 = vadd.xlane.f32.xlu1 %v983_v44 }
  0xa6   : > { %v874_v6 = vadd.s32 %v873_v63, %v745_v62  ;;  %vm715_vm9 = vcmp.eq.s32.totalorder %v1974_v20, %v2414_v13  ;;  %vm716_vm10 = vcmp.eq.s32.totalorder %v1976_v21, %v2414_v13  ;;  %vm328_vm11 = vcmp.eq.s32.totalorder %v1984_v25, %v2381_v49 }
  0xa7   : > { %v997_v7 = vshrl.u32 %v2416_v3, 16  ;;  %vm717_vm12 = vcmp.eq.s32.totalorder %v1978_v22, %v2414_v13  ;;  %vm718_vm13 = vcmp.eq.s32.totalorder %v1980_v23, %v2414_v13  ;;  %v779_v2 = vsel %vm715_vm9, 1, %v1784_v28 }
  0xa8   : > { %v2436_v8 = vadd.s32 %v874_v6, %v746_v41  ;;  %v780_v57 = vsel %vm716_vm10, 1, %v1784_v28  ;;  %v781_v9 = vsel %vm717_vm12, 1, %v1784_v28  ;;  %v782_v14 = vsel %vm718_vm13, 1, %v1784_v28  ;;  %v1185_v41 = vld [vmem:[%s2687_s3] sm:$0xff]  ;;  %v1187_v6 = vld [vmem:[%s2687_s3 + $0x10] sm:$0xff] }
  0xa9   : > { %865 = vadd.xlane.f32.xlu0 %v863_v15  ;;  %v999_v16 = vcvt.s32.f32 %v997_v7  ;;  %v1008_v17 = vadd.s32 %v780_v57, %v779_v2  ;;  %vm683_vm14 = vcmp.eq.s32.totalorder %v1974_v20, %v2420_v5  ;;  %vm684_vm15 = vcmp.eq.s32.totalorder %v1976_v21, %v2420_v5  ;;  %586 = vadd.xlane.f32.xlu1 %v584_v36  ;;  %v1188_v7 = vld [vmem:[%s2687_s3 + $0x18] sm:$0xff] }
  0xaa   : > { %v877_v30 = vshrl.u32 %v2436_v8, 16  ;;  %vm685_vm0 = vcmp.eq.s32.totalorder %v1978_v22, %v2420_v5  ;;  %vm686_vm1 = vcmp.eq.s32.totalorder %v1980_v23, %v2420_v5  ;;  %v747_v32 = vsel %vm683_vm14, 1, %v1784_v28 }
  0xab   : > { %v1009_v33 = vadd.s32 %v1008_v17, %v781_v9  ;;  %v748_v34 = vsel %vm684_vm15, 1, %v1784_v28  ;;  %v749_v35 = vsel %vm685_vm0, 1, %v1784_v28  ;;  %v750_v20 = vsel %vm686_vm1, 1, %v1784_v28 }
  0xac   : > { %v879_v37 = vcvt.s32.f32 %v877_v30  ;;  %v888_v21 = vadd.s32 %v748_v34, %v747_v32  ;;  %vm329_vm2 = vcmp.eq.s32.totalorder %v1986_v26, %v2381_v49  ;;  %vm330_vm3 = vcmp.eq.s32.totalorder %v1988_v27, %v2381_v49 }
  0xad   : > { %466 = vadd.xlane.f32.xlu0 %v464_v60  ;;  %v2458_v22 = vadd.s32 %v1009_v33, %v782_v14  ;;  %v391_v23 = vsel %vm327_vm8, 1, %v1784_v28  ;;  %v392_v11 = vsel %vm328_vm11, 1, %v1784_v28  ;;  %v393_v38 = vsel %vm329_vm2, 1, %v1784_v28  ;;  %1002 = vadd.xlane.f32.xlu1 %v999_v16 }
  0xae   : > { %v889_v18 = vadd.s32 %v888_v21, %v749_v35  ;;  %v394_v19 = vsel %vm330_vm3, 1, %v1784_v28  ;;  %v609_v39 = vadd.s32 %v392_v11, %v391_v23  ;;  %vm295_vm4 = vcmp.eq.s32.totalorder %v1982_v24, %v2384_v46 }
  0xaf   : > { %v1012_v40 = vshrl.u32 %v2458_v22, 16  ;;  %vm296_vm5 = vcmp.eq.s32.totalorder %v1984_v25, %v2384_v46  ;;  %vm297_vm6 = vcmp.eq.s32.totalorder %v1986_v26, %v2384_v46  ;;  %vm298_vm7 = vcmp.eq.s32.totalorder %v1988_v27, %v2384_v46 }
  0xb0   : > { %v2479_v29 = vadd.s32 %v889_v18, %v750_v20  ;;  %v610_v42 = vadd.s32 %v609_v39, %v393_v38  ;;  %v359_v43 = vsel %vm295_vm4, 1, %v1784_v28  ;;  %v360_v44 = vsel %vm296_vm5, 1, %v1784_v28 }
  0xb1   : > { %882 = vadd.xlane.f32.xlu0 %v879_v37  ;;  %v479_v15 = vcvt.s32.f32 %v477_v4  ;;  %v361_v45 = vsel %vm297_vm6, 1, %v1784_v28  ;;  %v489_v47 = vadd.s32 %v360_v44, %v359_v43  ;;  %601 = vadd.xlane.f32.xlu1 %v599_v12  ;;  %v1014_v36 = vcvt.s32.f32 %v1012_v40 }
  0xb2   : > { %v892_v49 = vshrl.u32 %v2479_v29, 16  ;;  %v2485_v50 = vadd.s32 %v610_v42, %v394_v19  ;;  %v362_v46 = vsel %vm298_vm7, 1, %v1784_v28  ;;  %vm331_vm8 = vcmp.eq.s32.totalorder %v1982_v24, %v2414_v13 }
  0xb3   : > { %v490_v51 = vadd.s32 %v489_v47, %v361_v45  ;;  %vm332_vm9 = vcmp.eq.s32.totalorder %v1984_v25, %v2414_v13  ;;  %vm333_vm10 = vcmp.eq.s32.totalorder %v1986_v26, %v2414_v13  ;;  %v996_v48 = vand.u32 65535, %v2416_v3 }
  0xb4   : > { %v894_v52 = vcvt.s32.f32 %v892_v49  ;;  %v613_v54 = vshrl.u32 %v2485_v50, 16  ;;  %vm334_vm11 = vcmp.eq.s32.totalorder %v1988_v27, %v2414_v13  ;;  %v395_v56 = vsel %vm331_vm8, 1, %v1784_v28 }
  0xb5   : > { %481 = vadd.xlane.f32.xlu0 %v479_v15  ;;  %v491_v55 = vadd.s32 %v490_v51, %v362_v46  ;;  %v396_v1 = vsel %vm332_vm9, 1, %v1784_v28  ;;  %1017 = vadd.xlane.f32.xlu1 %v1014_v36  ;;  %v397_v53 = vsel %vm333_vm10, 1, %v1784_v28  ;;  %v398_v58 = vsel %vm334_vm11, 1, %v1784_v28 }
  0xb6   : > { %v615_v31 = vcvt.s32.f32 %v613_v54  ;;  %v624_v59 = vadd.s32 %v396_v1, %v395_v56  ;;  %vm299_vm12 = vcmp.eq.s32.totalorder %v1982_v24, %v2420_v5  ;;  %vm300_vm13 = vcmp.eq.s32.totalorder %v1984_v25, %v2420_v5  ;;  %v1186_v24 = vld [vmem:[%s2687_s3 + $0x8] sm:$0xff] }
  0xb7   : > { %v493_v60 = vshrl.u32 %v491_v55, 16  ;;  %vm301_vm14 = vcmp.eq.s32.totalorder %v1986_v26, %v2420_v5  ;;  %vm302_vm15 = vcmp.eq.s32.totalorder %v1988_v27, %v2420_v5  ;;  %v363_v10 = vsel %vm299_vm12, 1, %v1784_v28 }
  0xb8   : > { %v625_v61 = vadd.s32 %v624_v59, %v397_v53  ;;  %v364_v62 = vsel %vm300_vm13, 1, %v1784_v28  ;;  %v876_v26 = vand.u32 65535, %v2436_v8  ;;  %v365_v63 = vsel %vm301_vm14, 1, %v1784_v28 }
  0xb9   : > { %897 = vadd.xlane.f32.xlu0 %v894_v52  ;;  %v495_v25 = vcvt.s32.f32 %v493_v60  ;;  %v504_v12 = vadd.s32 %v364_v62, %v363_v10  ;;  %618 = vadd.xlane.f32.xlu1 %v615_v31  ;;  %v998_v27 = vcvt.s32.f32 %v996_v48  ;;  %v366_v3 = vsel %vm302_vm15, 1, %v1784_v28 }
  0xba   : > { %v626_v13 = vadd.s32 %v625_v61, %v398_v58  ;;  %v1619_v5 = vpack.c.bf16 %v1186_v24, %v1185_v41  ;;  %v878_v8 = vcvt.s32.f32 %v876_v26  ;;  %v1011_v14 = vand.u32 65535, %v2458_v22 }
  0xbb   : > { %v505_v4 = vadd.s32 %v504_v12, %v365_v63  ;;  %v1623_v28 = vpack.c.bf16 %v1188_v7, %v1187_v6  ;;  %v891_v30 = vand.u32 65535, %v2479_v29  ;;  %v612_v33 = vand.u32 65535, %v2485_v50 }
  0xbc   : > { %v628_v2 = vshrl.u32 %v626_v13, 16  ;;  %1620 = vmatprep.subr.bf16.mxu0 %v1619_v5  ;;  %1627 = vmatprep.subr.bf16.mxu1 %v1619_v5  ;;  %v1013_v32 = vcvt.s32.f32 %v1011_v14  ;;  %v492_v35 = vand.u32 65535, %v491_v55  ;;  %v627_v37 = vand.u32 65535, %v626_v13 }
  0xbd   : > { %498 = vadd.xlane.f32.xlu0 %v495_v25  ;;  %v506_v57 = vadd.s32 %v505_v4, %v366_v3  ;;  %1000 = vadd.xlane.f32.xlu1 %v998_v27  ;;  %v893_v34 = vcvt.s32.f32 %v891_v30  ;;  %v614_v20 = vcvt.s32.f32 %v612_v33  ;;  %v2531_v25 = vand.u32 127, %v219_v0 }
  0xbe   : > { %v630_v9 = vcvt.s32.f32 %v628_v2  ;;  %1622 = vmatpush3.bf16.msra.mxu0 %v1619_v5  ;;  %1629 = vmatpush3.bf16.msra.mxu1 %v1619_v5  ;;  %v494_v21 = vcvt.s32.f32 %v492_v35  ;;  %v629_v23 = vcvt.s32.f32 %v627_v37  ;;  %vm1189_vm4 = vcmask 261120  }
  0xbf   : > { %v508_v16 = vshrl.u32 %v506_v57, 16  ;;  %1624 = vmatprep.subr.bf16.mxu0 %v1623_v28  ;;  %1628 = vmatprep.subr.bf16.mxu1 %v1623_v28  ;;  %v507_v22 = vand.u32 65535, %v506_v57  ;;  %v1785_v30 = vmov 0.0  }
  0xc1   : > { %880 = vadd.xlane.f32.xlu0 %v878_v8  ;;  %v510_v17 = vcvt.s32.f32 %v508_v16  ;;  %633 = vadd.xlane.f32.xlu1 %v630_v9  ;;  %v509_v11 = vcvt.s32.f32 %v507_v22 }
  0xc2   : > { %1626 = vmatpush3.bf16.msra.mxu0 %v1623_v28  ;;  %1630 = vmatpush3.bf16.msra.mxu1 %v1623_v28 }
  0xc5   : > { %513 = vadd.xlane.f32.xlu0 %v510_v17  ;;  %1015 = vadd.xlane.f32.xlu1 %v1013_v32 }
  0xc9   : > { %895 = vadd.xlane.f32.xlu0 %v893_v34  ;;  %616 = vadd.xlane.f32.xlu1 %v614_v20 }
  0xcd   : > { %496 = vadd.xlane.f32.xlu0 %v494_v21  ;;  %631 = vadd.xlane.f32.xlu1 %v629_v23 }
  0xd1   : > { %511 = vadd.xlane.f32.xlu0 %v509_v11 }
  0xdb   : > { %v808_v38 = vpop.xlane.xlu1 %807 }
  0xdc   : > { %v810_v1 = vcvt.f32.s32 %v808_v38 }
  0xdd   : > { %v793_v18 = vpop.xlane.xlu0 %792 }
  0xde   : > { %v795_v15 = vcvt.f32.s32 %v793_v18  ;;  %v811_v24 = vshll.u32 %v810_v1, 16 }
  0xe0   : > { %v928_v19 = vpop.xlane.xlu1 %927  ;;  %v796_v46 = vshll.u32 %v795_v15, 16 }
  0xe1   : > { %v930_v51 = vcvt.f32.s32 %v928_v19 }
  0xe3   : > { %v913_v39 = vpop.xlane.xlu0 %912  ;;  %v931_v31 = vshll.u32 %v930_v51, 16 }
  0xe4   : > { %v915_v29 = vcvt.f32.s32 %v913_v39 }
  0xe6   : > { %v529_v40 = vpop.xlane.xlu1 %528  ;;  %v916_v45 = vshll.u32 %v915_v29, 16 }
  0xe7   : > { %v531_v55 = vcvt.f32.s32 %v529_v40 }
  0xe9   : > { %v532_v10 = vshll.u32 %v531_v55, 16 }
  0xea   : > { %v409_v42 = vpop.xlane.xlu0 %408  ;;  %v911_v43 = vpop.xlane.xlu1 %910 }
  0xeb   : > { %v914_v44 = vcvt.f32.s32 %v911_v43  ;;  %v411_v58 = vcvt.f32.s32 %v409_v42 }
  0xed   : > { %v917_v50 = vadd.s32 %v916_v45, %v914_v44  ;;  %v412_v13 = vshll.u32 %v411_v58, 16 }
  0xee   : > { %v791_v47 = vpop.xlane.xlu0 %790  ;;  %v544_v49 = vpop.xlane.xlu1 %543 }
  0xef   : > { %v794_v36 = vcvt.f32.s32 %v791_v47  ;;  %vm1071_vm0 = vcmp.lt.s32.totalorder %v917_v50, 15  ;;  %v546_v6 = vcvt.f32.s32 %v544_v49 }
  0xf0   : > { %v1072_v59 = vsel %vm1071_vm0, %v917_v50, 15 }
  0xf1   : > { %v797_v54 = vadd.s32 %v796_v46, %v794_v36  ;;  %v1113_v27 = vadd.s32 16, %v1072_v59  ;;  %v547_v28 = vshll.u32 %v546_v6, 16 }
  0xf2   : > { %v424_v52 = vpop.xlane.xlu0 %423  ;;  %v926_v48 = vpop.xlane.xlu1 %925 }
  0xf3   : > { %v929_v56 = vcvt.f32.s32 %v926_v48  ;;  %vm1055_vm1 = vcmp.lt.s32.totalorder %v797_v54, 15  ;;  %vm1129_vm6 = vcmp.eq.s32.totalorder %v2531_v25, %v1113_v27  ;;  %v426_v0 = vcvt.f32.s32 %v424_v52 }
  0xf4   : > { %v1056_v26 = vsel %vm1055_vm1, %v797_v54, 15 }
  0xf5   : > { %v932_v62 = vadd.s32 %v931_v31, %v929_v56  ;;  %v1105_v2 = vadd.s32 16, %v1056_v26  ;;  %v427_v37 = vshll.u32 %v426_v0, 16 }
  0xf6   : > { %v806_v53 = vpop.xlane.xlu0 %805  ;;  %v527_v61 = vpop.xlane.xlu1 %526 }
  0xf7   : > { %v809_v60 = vcvt.f32.s32 %v806_v53  ;;  %v530_v41 = vcvt.f32.s32 %v527_v61  ;;  %vm1073_vm2 = vcmp.lt.s32.totalorder %v932_v62, 15  ;;  %vm1121_vm11 = vcmp.eq.s32.totalorder %v2531_v25, %v1105_v2 }
  0xf8   : > { %v1074_v9 = vsel %vm1073_vm2, %v932_v62, 15 }
  0xf9   : > { %v533_v63 = vadd.s32 %v532_v10, %v530_v41  ;;  %v812_v3 = vadd.s32 %v811_v24, %v809_v60  ;;  %v1114_v33 = vadd.s32 16, %v1074_v9 }
  0xfa   : > { %v407_v12 = vpop.xlane.xlu0 %406  ;;  %v943_v5 = vpop.xlane.xlu1 %942 }
  0xfb   : > { %v410_v4 = vcvt.f32.s32 %v407_v12  ;;  %vm1039_vm3 = vcmp.lt.s32.totalorder %v533_v63, 15  ;;  %vm1057_vm7 = vcmp.lt.s32.totalorder %v812_v3, 15  ;;  %vm1130_vm15 = vcmp.eq.s32.totalorder %v2531_v25, %v1114_v33 }
  0xfc   : > { %v1040_v8 = vsel %vm1039_vm3, %v533_v63, 15  ;;  %v1058_v34 = vsel %vm1057_vm7, %v812_v3, 15  ;;  %v945_v42 = vcvt.f32.s32 %v943_v5 }
  0xfd   : > { %v413_v7 = vadd.s32 %v412_v13, %v410_v4  ;;  %vm1097_vm5 = vcmp.eq.s32.totalorder %v2531_v25, %v1040_v8  ;;  %v1106_v11 = vadd.s32 16, %v1058_v34 }
  0xfe   : > { %v823_v57 = vpop.xlane.xlu0 %822  ;;  %v542_v14 = vpop.xlane.xlu1 %541  ;;  %vm1145_vm9 = vmor %vm1097_vm5, %vm1129_vm6  ;;  %v946_v36 = vshll.u32 %v945_v42, 16 }
  0xff   : > { %vm1023_vm8 = vcmp.lt.s32.totalorder %v413_v7, 15  ;;  %v545_v16 = vcvt.f32.s32 %v542_v14  ;;  %v1536_v32 = vsel %vm1145_vm9, 1.0, %v1785_v30  ;;  %vm1122_vm3 = vcmp.eq.s32.totalorder %v2531_v25, %v1106_v11 }
 0x100   : > { %v1024_v17 = vsel %vm1023_vm8, %v413_v7, 15  ;;  %1607 = vmatprep.mubr.msk.f32.mxu1 %vm1189_vm4, %v1536_v32  ;;  %v825_v47 = vcvt.f32.s32 %v823_v57 }
 0x101   : > { %vm1089_vm10 = vcmp.eq.s32.totalorder %v2531_v25, %v1024_v17  ;;  %v548_v35 = vadd.s32 %v547_v28, %v545_v16 }
 0x102   : > { %v422_v20 = vpop.xlane.xlu0 %421  ;;  %vm1137_vm12 = vmor %vm1089_vm10, %vm1121_vm11  ;;  %v958_v23 = vpop.xlane.xlu1 %957  ;;  %v826_v52 = vshll.u32 %v825_v47, 16 }
 0x103   : > { %v425_v21 = vcvt.f32.s32 %v422_v20  ;;  %v1528_v22 = vsel %vm1137_vm12, 1.0, %v1785_v30  ;;  %vm1041_vm13 = vcmp.lt.s32.totalorder %v548_v35, 15  ;;  %v960_v54 = vcvt.f32.s32 %v958_v23 }
 0x104   : > { %1595 = vmatprep.mubr.msk.f32.mxu0 %vm1189_vm4, %v1528_v22  ;;  %v1042_v38 = vsel %vm1041_vm13, %v548_v35, 15 }
 0x105   : > { %v428_v18 = vadd.s32 %v427_v37, %v425_v21  ;;  %vm1098_vm14 = vcmp.eq.s32.totalorder %v2531_v25, %v1042_v38  ;;  %v961_v58 = vshll.u32 %v960_v54, 16 }
 0x106   : > { %v838_v19 = vpop.xlane.xlu0 %837  ;;  %v559_v39 = vpop.xlane.xlu1 %558  ;;  %vm1146_vm1 = vmor %vm1098_vm14, %vm1130_vm15 }
 0x107   : > { %vm1025_vm0 = vcmp.lt.s32.totalorder %v428_v18, 15  ;;  %v1537_v29 = vsel %vm1146_vm1, 1.0, %v1785_v30  ;;  %v561_v1 = vcvt.f32.s32 %v559_v39  ;;  %v840_v53 = vcvt.f32.s32 %v838_v19 }
 0x108   : > { %v1026_v40 = vsel %vm1025_vm0, %v428_v18, 15  ;;  %1608 = vmatmul.mubr.msk.f32.vlgmr.msra.gmra.mrb[0].mxu1 %vm1189_vm4, %v1537_v29 }
 0x109   : > { %vm1090_vm2 = vcmp.eq.s32.totalorder %v2531_v25, %v1026_v40  ;;  %v562_v41 = vshll.u32 %v561_v1, 16  ;;  %v841_v63 = vshll.u32 %v840_v53, 16 }
 0x10a   : > { %v439_v43 = vpop.xlane.xlu0 %438  ;;  %vm1138_vm5 = vmor %vm1090_vm2, %vm1122_vm3  ;;  %v941_v15 = vpop.xlane.xlu1 %940 }
 0x10b   : > { %v1529_v44 = vsel %vm1138_vm5, 1.0, %v1785_v30  ;;  %v944_v45 = vcvt.f32.s32 %v941_v15  ;;  %v441_v60 = vcvt.f32.s32 %v439_v43 }
 0x10c   : > { %1596 = vmatmul.mubr.msk.f32.vlgmr.msra.gmra.mrb[0].mxu0 %vm1189_vm4, %v1529_v44 }
 0x10d   : > { %v947_v51 = vadd.s32 %v946_v36, %v944_v45  ;;  %v442_v4 = vshll.u32 %v441_v60, 16 }
 0x10e   : > { %v821_v49 = vpop.xlane.xlu0 %820  ;;  %v574_v46 = vpop.xlane.xlu1 %573 }
 0x10f   : > { %v824_v50 = vcvt.f32.s32 %v821_v49  ;;  %vm1075_vm6 = vcmp.lt.s32.totalorder %v947_v51, 15  ;;  %v576_v2 = vcvt.f32.s32 %v574_v46 }
 0x110   : > { %v1076_v61 = vsel %vm1075_vm6, %v947_v51, 15 }
 0x111   : > { %v827_v55 = vadd.s32 %v826_v52, %v824_v50  ;;  %v1115_v12 = vadd.s32 16, %v1076_v61  ;;  %v577_v17 = vshll.u32 %v576_v2, 16 }
 0x112   : > { %v454_v48 = vpop.xlane.xlu0 %453  ;;  %v956_v56 = vpop.xlane.xlu1 %955 }
 0x113   : > { %v959_v31 = vcvt.f32.s32 %v956_v56  ;;  %vm1059_vm7 = vcmp.lt.s32.totalorder %v827_v55, 15  ;;  %vm1131_vm11 = vcmp.eq.s32.totalorder %v2531_v25, %v1115_v12  ;;  %v456_v14 = vcvt.f32.s32 %v454_v48 }
 0x114   : > { %v1060_v27 = vsel %vm1059_vm7, %v827_v55, 15 }
 0x115   : > { %v962_v24 = vadd.s32 %v961_v58, %v959_v31  ;;  %v1107_v8 = vadd.s32 16, %v1060_v27  ;;  %v457_v22 = vshll.u32 %v456_v14, 16 }
 0x116   : > { %v836_v59 = vpop.xlane.xlu0 %835  ;;  %v557_v62 = vpop.xlane.xlu1 %556 }
 0x117   : > { %v839_v10 = vcvt.f32.s32 %v836_v59  ;;  %v560_v26 = vcvt.f32.s32 %v557_v62  ;;  %vm1077_vm8 = vcmp.lt.s32.totalorder %v962_v24, 15  ;;  %vm1123_vm0 = vcmp.eq.s32.totalorder %v2531_v25, %v1107_v8 }
 0x118   : > { %v1078_v28 = vsel %vm1077_vm8, %v962_v24, 15 }
 0x119   : > { %v563_v13 = vadd.s32 %v562_v41, %v560_v26  ;;  %v842_v5 = vadd.s32 %v841_v63, %v839_v10  ;;  %v1116_v35 = vadd.s32 16, %v1078_v28 }
 0x11a   : > { %v437_v3 = vpop.xlane.xlu0 %436  ;;  %v973_v7 = vpop.xlane.xlu1 %972 }
 0x11b   : > { %v440_v6 = vcvt.f32.s32 %v437_v3  ;;  %vm1043_vm9 = vcmp.lt.s32.totalorder %v563_v13, 15  ;;  %vm1061_vm12 = vcmp.lt.s32.totalorder %v842_v5, 15  ;;  %vm1132_vm5 = vcmp.eq.s32.totalorder %v2531_v25, %v1116_v35 }
 0x11c   : > { %v1044_v57 = vsel %vm1043_vm9, %v563_v13, 15  ;;  %v1062_v20 = vsel %vm1061_vm12, %v842_v5, 15  ;;  %v975_v44 = vcvt.f32.s32 %v973_v7 }
 0x11d   : > { %v443_v0 = vadd.s32 %v442_v4, %v440_v6  ;;  %vm1099_vm10 = vcmp.eq.s32.totalorder %v2531_v25, %v1044_v57  ;;  %v1108_v18 = vadd.s32 16, %v1062_v20 }
 0x11e   : > { %v853_v9 = vpop.xlane.xlu0 %852  ;;  %v572_v16 = vpop.xlane.xlu1 %571  ;;  %vm1147_vm14 = vmor %vm1099_vm10, %vm1131_vm11  ;;  %v976_v50 = vshll.u32 %v975_v44, 16 }
 0x11f   : > { %vm1027_vm13 = vcmp.lt.s32.totalorder %v443_v0, 15  ;;  %v575_v33 = vcvt.f32.s32 %v572_v16  ;;  %v1538_v34 = vsel %vm1147_vm14, 1.0, %v1785_v30  ;;  %vm1124_vm9 = vcmp.eq.s32.totalorder %v2531_v25, %v1108_v18 }
 0x120   : > { %v1028_v32 = vsel %vm1027_vm13, %v443_v0, 15  ;;  %1610 = vmatprep.mubr.msk.f32.mxu1 %vm1189_vm4, %v1538_v34  ;;  %v855_v49 = vcvt.f32.s32 %v853_v9 }
 0x121   : > { %vm1091_vm15 = vcmp.eq.s32.totalorder %v2531_v25, %v1028_v32  ;;  %v578_v37 = vadd.s32 %v577_v17, %v575_v33 }
 0x122   : > { %v452_v21 = vpop.xlane.xlu0 %451  ;;  %vm1139_vm1 = vmor %vm1091_vm15, %vm1123_vm0  ;;  %v988_v38 = vpop.xlane.xlu1 %987  ;;  %v856_v48 = vshll.u32 %v855_v49, 16 }
 0x123   : > { %v455_v23 = vcvt.f32.s32 %v452_v21  ;;  %v1530_v11 = vsel %vm1139_vm1, 1.0, %v1785_v30  ;;  %vm1045_vm2 = vcmp.lt.s32.totalorder %v578_v37, 15  ;;  %v990_v55 = vcvt.f32.s32 %v988_v38 }
 0x124   : > { %1598 = vmatprep.mubr.msk.f32.mxu0 %vm1189_vm4, %v1530_v11  ;;  %v1046_v19 = vsel %vm1045_vm2, %v578_v37, 15 }
 0x125   : > { %v458_v39 = vadd.s32 %v457_v22, %v455_v23  ;;  %vm1100_vm3 = vcmp.eq.s32.totalorder %v2531_v25, %v1046_v19  ;;  %v991_v60 = vshll.u32 %v990_v55, 16 }
 0x126   : > { %v868_v40 = vpop.xlane.xlu0 %867  ;;  %v589_v29 = vpop.xlane.xlu1 %588  ;;  %vm1148_vm7 = vmor %vm1100_vm3, %vm1132_vm5 }
 0x127   : > { %vm1029_vm6 = vcmp.lt.s32.totalorder %v458_v39, 15  ;;  %v1539_v43 = vsel %vm1148_vm7, 1.0, %v1785_v30  ;;  %v591_v53 = vcvt.f32.s32 %v589_v29  ;;  %v870_v59 = vcvt.f32.s32 %v868_v40 }
 0x128   : > { %v1030_v42 = vsel %vm1029_vm6, %v458_v39, 15  ;;  %1611 = vmatmul.mubr.msk.f32.gmra.mrb[2].mxu1 %vm1189_vm4, %v1539_v43 }
 0x129   : > { %vm1092_vm8 = vcmp.eq.s32.totalorder %v2531_v25, %v1030_v42  ;;  %v592_v26 = vshll.u32 %v591_v53, 16  ;;  %v871_v27 = vshll.u32 %v870_v59, 16 }
 0x12a   : > { %v469_v15 = vpop.xlane.xlu0 %468  ;;  %vm1140_vm10 = vmor %vm1092_vm8, %vm1124_vm9  ;;  %v971_v47 = vpop.xlane.xlu1 %970 }
 0x12b   : > { %v1531_v45 = vsel %vm1140_vm10, 1.0, %v1785_v30  ;;  %v974_v36 = vcvt.f32.s32 %v971_v47  ;;  %v471_v10 = vcvt.f32.s32 %v469_v15 }
 0x12c   : > { %1599 = vmatmul.mubr.msk.f32.gmra.mrb[2].mxu0 %vm1189_vm4, %v1531_v45 }
 0x12d   : > { %v977_v54 = vadd.s32 %v976_v50, %v974_v36  ;;  %v472_v6 = vshll.u32 %v471_v10, 16 }
 0x12e   : > { %v851_v46 = vpop.xlane.xlu0 %850  ;;  %v604_v52 = vpop.xlane.xlu1 %603 }
 0x12f   : > { %v854_v51 = vcvt.f32.s32 %v851_v46  ;;  %vm1079_vm11 = vcmp.lt.s32.totalorder %v977_v54, 15  ;;  %v606_v57 = vcvt.f32.s32 %v604_v52 }
 0x130   : > { %v1080_v62 = vsel %vm1079_vm11, %v977_v54, 15 }
 0x131   : > { %v857_v1 = vadd.s32 %v856_v48, %v854_v51  ;;  %v1117_v13 = vadd.s32 16, %v1080_v62  ;;  %v607_v33 = vshll.u32 %v606_v57, 16 }
 0x132   : > { %v484_v56 = vpop.xlane.xlu0 %483  ;;  %v986_v31 = vpop.xlane.xlu1 %985 }
 0x133   : > { %v989_v58 = vcvt.f32.s32 %v986_v31  ;;  %vm1063_vm12 = vcmp.lt.s32.totalorder %v857_v1, 15  ;;  %vm1133_vm0 = vcmp.eq.s32.totalorder %v2531_v25, %v1117_v13  ;;  %v486_v16 = vcvt.f32.s32 %v484_v56 }
 0x134   : > { %v1064_v3 = vsel %vm1063_vm12, %v857_v1, 15 }
 0x135   : > { %v992_v63 = vadd.s32 %v991_v60, %v989_v58  ;;  %v1109_v0 = vadd.s32 16, %v1064_v3  ;;  %v487_v11 = vshll.u32 %v486_v16, 16 }
 0x136   : > { %v866_v61 = vpop.xlane.xlu0 %865  ;;  %v587_v24 = vpop.xlane.xlu1 %586 }
 0x137   : > { %v869_v41 = vcvt.f32.s32 %v866_v61  ;;  %v590_v12 = vcvt.f32.s32 %v587_v24  ;;  %vm1081_vm13 = vcmp.lt.s32.totalorder %v992_v63, 15  ;;  %vm1125_vm6 = vcmp.eq.s32.totalorder %v2531_v25, %v1109_v0 }
 0x138   : > { %v1082_v17 = vsel %vm1081_vm13, %v992_v63, 15 }
 0x139   : > { %v593_v4 = vadd.s32 %v592_v26, %v590_v12  ;;  %v872_v7 = vadd.s32 %v871_v27, %v869_v41  ;;  %v1118_v37 = vadd.s32 16, %v1082_v17 }
 0x13a   : > { %v467_v5 = vpop.xlane.xlu0 %466  ;;  %v1003_v8 = vpop.xlane.xlu1 %1002 }
 0x13b   : > { %v470_v2 = vcvt.f32.s32 %v467_v5  ;;  %vm1047_vm14 = vcmp.lt.s32.totalorder %v593_v4, 15  ;;  %vm1065_vm1 = vcmp.lt.s32.totalorder %v872_v7, 15  ;;  %vm1134_vm10 = vcmp.eq.s32.totalorder %v2531_v25, %v1118_v37 }
 0x13c   : > { %v1048_v9 = vsel %vm1047_vm14, %v593_v4, 15  ;;  %v1066_v21 = vsel %vm1065_vm1, %v872_v7, 15  ;;  %v1005_v45 = vcvt.f32.s32 %v1003_v8 }
 0x13d   : > { %v473_v14 = vadd.s32 %v472_v6, %v470_v2  ;;  %vm1101_vm15 = vcmp.eq.s32.totalorder %v2531_v25, %v1048_v9  ;;  %v1110_v39 = vadd.s32 16, %v1066_v21 }
 0x13e   : > { %v883_v28 = vpop.xlane.xlu0 %882  ;;  %v602_v32 = vpop.xlane.xlu1 %601  ;;  %vm1149_vm3 = vmor %vm1101_vm15, %vm1133_vm0  ;;  %v1006_v51 = vshll.u32 %v1005_v45, 16 }
 0x13f   : > { %vm1031_vm2 = vcmp.lt.s32.totalorder %v473_v14, 15  ;;  %v605_v35 = vcvt.f32.s32 %v602_v32  ;;  %v1540_v20 = vsel %vm1149_vm3, 1.0, %v1785_v30  ;;  %vm1126_vm14 = vcmp.eq.s32.totalorder %v2531_v25, %v1110_v39 }
 0x140   : > { %v1032_v34 = vsel %vm1031_vm2, %v473_v14, 15  ;;  %1613 = vmatprep.mubr.msk.f32.mxu1 %vm1189_vm4, %v1540_v20  ;;  %v885_v50 = vcvt.f32.s32 %v883_v28 }
 0x141   : > { %vm1093_vm5 = vcmp.eq.s32.totalorder %v2531_v25, %v1032_v34  ;;  %v608_v22 = vadd.s32 %v607_v33, %v605_v35 }
 0x142   : > { %v482_v23 = vpop.xlane.xlu0 %481  ;;  %vm1141_vm7 = vmor %vm1093_vm5, %vm1125_vm6  ;;  %v1018_v19 = vpop.xlane.xlu1 %1017  ;;  %v886_v56 = vshll.u32 %v885_v50, 16  ;;  %v1383_v50 = vld [vmem:[%s1924_s22] sm:$0xff] }
 0x143   : > { %v485_v38 = vcvt.f32.s32 %v482_v23  ;;  %v1532_v18 = vsel %vm1141_vm7, 1.0, %v1785_v30  ;;  %vm1049_vm8 = vcmp.lt.s32.totalorder %v608_v22, 15  ;;  %v1020_v1 = vcvt.f32.s32 %v1018_v19 }
 0x144   : > { %1601 = vmatprep.mubr.msk.f32.mxu0 %vm1189_vm4, %v1532_v18  ;;  %v1050_v40 = vsel %vm1049_vm8, %v608_v22, 15 }
 0x145   : > { %v488_v29 = vadd.s32 %v487_v11, %v485_v38  ;;  %vm1102_vm9 = vcmp.eq.s32.totalorder %v2531_v25, %v1050_v40  ;;  %v1021_v60 = vshll.u32 %v1020_v1, 16 }
 0x146   : > { %v898_v42 = vpop.xlane.xlu0 %897  ;;  %v619_v43 = vpop.xlane.xlu1 %618  ;;  %vm1150_vm12 = vmor %vm1102_vm9, %vm1134_vm10 }
 0x147   : > { %vm1033_vm11 = vcmp.lt.s32.totalorder %v488_v29, 15  ;;  %v1541_v15 = vsel %vm1150_vm12, 1.0, %v1785_v30  ;;  %v900_v58 = vcvt.f32.s32 %v898_v42  ;;  %v621_v61 = vcvt.f32.s32 %v619_v43 }
 0x148   : > { %v1034_v44 = vsel %vm1033_vm11, %v488_v29, 15  ;;  %1614 = vmatmul.mubr.msk.f32.gmra.mrb[4].mxu1 %vm1189_vm4, %v1541_v15  ;;  %v1391_v15 = vld [vmem:[%s1924_s22 + $0x40] sm:$0xff] }
 0x149   : > { %vm1094_vm13 = vcmp.eq.s32.totalorder %v2531_v25, %v1034_v44  ;;  %v901_v63 = vshll.u32 %v900_v58, 16  ;;  %v622_v13 = vshll.u32 %v621_v61, 16  ;;  %v1392_v44 = vld [vmem:[%s1924_s22 + $0x48] sm:$0xff] }
 0x14a   : > { %v499_v47 = vpop.xlane.xlu0 %498  ;;  %vm1142_vm15 = vmor %vm1094_vm13, %vm1126_vm14  ;;  %v1001_v49 = vpop.xlane.xlu1 %1000 }
 0x14b   : > { %v1533_v36 = vsel %vm1142_vm15, 1.0, %v1785_v30  ;;  %v1004_v46 = vcvt.f32.s32 %v1001_v49  ;;  %v501_v62 = vcvt.f32.s32 %v499_v47  ;;  %v1384_v47 = vld [vmem:[%s1924_s22 + $0x8] sm:$0xff] }
 0x14c   : > { %1602 = vmatmul.mubr.msk.f32.gmra.mrb[4].mxu0 %vm1189_vm4, %v1533_v36 }
 0x14d   : > { %v1007_v54 = vadd.s32 %v1006_v51, %v1004_v46  ;;  %v502_v2 = vshll.u32 %v501_v62, 16  ;;  %v1396_v62 = vld [vmem:[%s1924_s22 + $0x68] sm:$0xff] }
 0x14e   : > { %v881_v52 = vpop.xlane.xlu0 %880  ;;  %v634_v55 = vpop.xlane.xlu1 %633 }
 0x14f   : > { %v884_v48 = vcvt.f32.s32 %v881_v52  ;;  %vm1083_vm0 = vcmp.lt.s32.totalorder %v1007_v54, 15  ;;  %v636_v3 = vcvt.f32.s32 %v634_v55 }
 0x150   : > { %v1084_v41 = vsel %vm1083_vm0, %v1007_v54, 15  ;;  %v1394_v54 = vld [vmem:[%s1924_s22 + $0x58] sm:$0xff] }
 0x151   : > { %v887_v31 = vadd.s32 %v886_v56, %v884_v48  ;;  %v1119_v5 = vadd.s32 16, %v1084_v41  ;;  %v637_v17 = vshll.u32 %v636_v3, 16  ;;  %v1393_v48 = vld [vmem:[%s1924_s22 + $0x50] sm:$0xff]  ;;  %v1386_v56 = vld [vmem:[%s1924_s22 + $0x18] sm:$0xff]  ;;  %v1395_v41 = vld [vmem:[%s1924_s22 + $0x60] sm:$0xff] }
 0x152   : > { %v514_v53 = vpop.xlane.xlu0 %513  ;;  %v1016_v59 = vpop.xlane.xlu1 %1015 }
 0x153   : > { %v1019_v10 = vcvt.f32.s32 %v1016_v59  ;;  %vm1067_vm1 = vcmp.lt.s32.totalorder %v887_v31, 15  ;;  %v516_v0 = vcvt.f32.s32 %v514_v53  ;;  %vm1135_vm6 = vcmp.eq.s32.totalorder %v2531_v25, %v1119_v5  ;;  %v1385_v53 = vld [vmem:[%s1924_s22 + $0x10] sm:$0xff] }
 0x154   : > { %v1068_v6 = vsel %vm1067_vm1, %v887_v31, 15 }
 0x155   : > { %v1022_v24 = vadd.s32 %v1021_v60, %v1019_v10  ;;  %v1111_v16 = vadd.s32 16, %v1068_v6  ;;  %v517_v22 = vshll.u32 %v516_v0, 16 }
 0x156   : > { %v896_v26 = vpop.xlane.xlu0 %895  ;;  %v617_v27 = vpop.xlane.xlu1 %616 }
 0x157   : > { %v899_v12 = vcvt.f32.s32 %v896_v26  ;;  %vm1085_vm2 = vcmp.lt.s32.totalorder %v1022_v24, 15  ;;  %v620_v4 = vcvt.f32.s32 %v617_v27  ;;  %vm1127_vm11 = vcmp.eq.s32.totalorder %v2531_v25, %v1111_v16  ;;  %v1388_v26 = vld [vmem:[%s1924_s22 + $0x28] sm:$0xff]  ;;  %v1387_v27 = vld [vmem:[%s1924_s22 + $0x20] sm:$0xff] }
 0x158   : > { %v1086_v9 = vsel %vm1085_vm2, %v1022_v24, 15 }
 0x159   : > { %v902_v7 = vadd.s32 %v901_v63, %v899_v12  ;;  %v623_v8 = vadd.s32 %v622_v13, %v620_v4  ;;  %v1120_v35 = vadd.s32 16, %v1086_v9 }
 0x15a   : > { %v497_v57 = vpop.xlane.xlu0 %496  ;;  %v632_v28 = vpop.xlane.xlu1 %631 }
 0x15b   : > { %vm1069_vm3 = vcmp.lt.s32.totalorder %v902_v7, 15  ;;  %v500_v14 = vcvt.f32.s32 %v497_v57  ;;  %vm1051_vm5 = vcmp.lt.s32.totalorder %v623_v8, 15  ;;  %v635_v32 = vcvt.f32.s32 %v632_v28  ;;  %v1390_v57 = vld [vmem:[%s1924_s22 + $0x38] sm:$0xff] }
 0x15c   : > { %v1052_v33 = vsel %vm1051_vm5, %v623_v8, 15  ;;  %v1070_v20 = vsel %vm1069_vm3, %v902_v7, 15  ;;  %vm1136_vm15 = vcmp.eq.s32.totalorder %v2531_v25, %v1120_v35  ;;  %v1398_v7 = vld [vmem:[%s1924_s22 + $0x78] sm:$0xff] }
 0x15d   : > { %v503_v34 = vadd.s32 %v502_v2, %v500_v14  ;;  %v638_v37 = vadd.s32 %v637_v17, %v635_v32  ;;  %vm1103_vm7 = vcmp.eq.s32.totalorder %v2531_v25, %v1052_v33  ;;  %v1112_v18 = vadd.s32 16, %v1070_v20  ;;  %v1397_v2 = vld [vmem:[%s1924_s22 + $0x70] sm:$0xff] }
 0x15e   : > { %v512_v21 = vpop.xlane.xlu0 %511  ;;  %vm1151_vm9 = vmor %vm1103_vm7, %vm1135_vm6  ;;  %v1389_v14 = vld [vmem:[%s1924_s22 + $0x30] sm:$0xff]  ;;  %s1713_s22 = scalar_lea.vmem %s2638_s8, 2048 }
 0x15f   : > { %vm1035_vm8 = vcmp.lt.s32.totalorder %v503_v34, 15  ;;  %v515_v23 = vcvt.f32.s32 %v512_v21  ;;  %vm1053_vm10 = vcmp.lt.s32.totalorder %v638_v37, 15  ;;  %v1542_v38 = vsel %vm1151_vm9, 1.0, %v1785_v30  ;;  %p1714_p6 = scmp.ne.s32.totalorder %s2638_s8, %s1713_s22  ;;  %p1721_p10 = scmp.lt.s32.totalorder %s1719_s25, %s1713_s22 }
 0x160   : > { %v1036_v11 = vsel %vm1035_vm8, %v503_v34, 15  ;;  %v1054_v19 = vsel %vm1053_vm10, %v638_v37, 15  ;;  %1616 = vmatprep.mubr.msk.f32.mxu1 %vm1189_vm4, %v1542_v38  ;;  %vm1128_vm3 = vcmp.eq.s32.totalorder %v2531_v25, %v1112_v18 }
 0x161   : > { %v518_v39 = vadd.s32 %v517_v22, %v515_v23  ;;  %vm1095_vm12 = vcmp.eq.s32.totalorder %v2531_v25, %v1036_v11  ;;  %vm1104_vm13 = vcmp.eq.s32.totalorder %v2531_v25, %v1054_v19  ;;  %p1715_p12 = pnand %p1714_p6, %p2695_p11  ;;  %p1722_p0 = por %p1721_p10, %p1720_p8 }
 0x162   : > { %vm1143_vm14 = vmor %vm1095_vm12, %vm1127_vm11 }
 0x163   : > { %vm1037_vm0 = vcmp.lt.s32.totalorder %v518_v39, 15  ;;  %v1534_v40 = vsel %vm1143_vm14, 1.0, %v1785_v30  ;;  %vm1152_vm1 = vmor %vm1104_vm13, %vm1136_vm15  ;;  %p1716_p13 = pneg %p1715_p12 }
 0x164   : > { %v1038_v29 = vsel %vm1037_vm0, %v518_v39, 15  ;;  %1604 = vmatprep.mubr.msk.f32.mxu0 %vm1189_vm4, %v1534_v40  ;;  %v1543_v42 = vsel %vm1152_vm1, 1.0, %v1785_v30 }
 0x165   : > { %vm1096_vm2 = vcmp.eq.s32.totalorder %v2531_v25, %v1038_v29  ;;  %1617 = vmatmul.mubr.msk.f32.gmra.mrb[6].mxu1 %vm1189_vm4, %v1543_v42  ;;  %p1723_p2 = pnand %p1722_p0, %p1716_p13 }
 0x166   : > { %vm1144_vm5 = vmor %vm1096_vm2, %vm1128_vm3 }
 0x167   : > { %v1535_v43 = vsel %vm1144_vm5, 1.0, %v1785_v30 }
 0x168   : > { %1605 = vmatmul.mubr.msk.f32.gmra.mrb[6].mxu0 %vm1189_vm4, %v1535_v43 }
 0x1db   : > { %v1609_v45 = vpop.f32.mrb[0].mxu1 }
 0x1dc   : > { %v1408_v36 = vadd.f32 %v1609_v45, %v1392_v44  ;;  %v1344_v49 = vpop.f32.mrb[1].mxu1 }
 0x1dd   : > { %v1407_v46 = vadd.f32 %v1391_v15, %v1344_v49 }
 0x1de   : > { %1424 = vst [vmem:[%s2603_s20 + $0x48] sm:$0xff] %v1408_v36 }
 0x1df   : > { %v1597_v25 = vpop.f32.mrb[0].mxu0  ;;  %1423 = vst [vmem:[%s2603_s20 + $0x40] sm:$0xff] %v1407_v46 }
 0x1e0   : > { %v1400_v30 = vadd.f32 %v1597_v25, %v1384_v47  ;;  %v1304_v51 = vpop.f32.mrb[1].mxu0 }
 0x1e1   : > { %v1399_v52 = vadd.f32 %v1383_v50, %v1304_v51 }
 0x1e2   : > { %1416 = vst [vmem:[%s2603_s20 + $0x8] sm:$0xff] %v1400_v30 }
 0x1e3   : > { %1415 = vst [vmem:[%s2603_s20] sm:$0xff] %v1399_v52 }
 0x1fb   : > { %v1612_v55 = vpop.f32.mrb[2].mxu1 }
 0x1fc   : > { %v1410_v1 = vadd.f32 %v1612_v55, %v1394_v54  ;;  %v1354_v31 = vpop.f32.mrb[3].mxu1 }
 0x1fd   : > { %v1409_v58 = vadd.f32 %v1393_v48, %v1354_v31 }
 0x1fe   : > { %1426 = vst [vmem:[%s2603_s20 + $0x58] sm:$0xff] %v1410_v1 }
 0x1ff   : > { %v1600_v59 = vpop.f32.mrb[2].mxu0  ;;  %1425 = vst [vmem:[%s2603_s20 + $0x50] sm:$0xff] %v1409_v58 }
 0x200   : > { %v1402_v60 = vadd.f32 %v1600_v59, %v1386_v56  ;;  %v1314_v61 = vpop.f32.mrb[3].mxu0 }
 0x201   : > { %v1401_v10 = vadd.f32 %v1385_v53, %v1314_v61 }
 0x202   : > { %1418 = vst [vmem:[%s2603_s20 + $0x18] sm:$0xff] %v1402_v60 }
 0x203   : > { %1417 = vst [vmem:[%s2603_s20 + $0x10] sm:$0xff] %v1401_v10 }
 0x21b   : > { %v1615_v24 = vpop.f32.mrb[4].mxu1 }
 0x21c   : > { %v1412_v63 = vadd.f32 %v1615_v24, %v1396_v62  ;;  %v1364_v12 = vpop.f32.mrb[5].mxu1 }
 0x21d   : > { %v1411_v13 = vadd.f32 %v1395_v41, %v1364_v12 }
 0x21e   : > { %1428 = vst [vmem:[%s2603_s20 + $0x68] sm:$0xff] %v1412_v63 }
 0x21f   : > { %v1603_v3 = vpop.f32.mrb[4].mxu0  ;;  %1427 = vst [vmem:[%s2603_s20 + $0x60] sm:$0xff] %v1411_v13 }
 0x220   : > { %v1404_v4 = vadd.f32 %v1603_v3, %v1388_v26  ;;  %v1324_v5 = vpop.f32.mrb[5].mxu0 }
 0x221   : > { %v1403_v6 = vadd.f32 %v1387_v27, %v1324_v5 }
 0x222   : > { %1420 = vst [vmem:[%s2603_s20 + $0x28] sm:$0xff] %v1404_v4 }
 0x223   : > { %1419 = vst [vmem:[%s2603_s20 + $0x20] sm:$0xff] %v1403_v6 }
 0x238   : > { %v1618_v8 = vpop.f32.mrb[6].mxu1 }
 0x239   : > { %v1414_v0 = vadd.f32 %v1618_v8, %v1398_v7  ;;  %v1374_v9 = vpop.f32.mrb[7].mxu1 }
 0x23a   : > { %v1413_v28 = vadd.f32 %v1397_v2, %v1374_v9 }
 0x23b   : > { %v1606_v16 = vpop.f32.mrb[6].mxu0  ;;  %1430 = vst [vmem:[%s2603_s20 + $0x78] sm:$0xff] %v1414_v0 }
 0x23c   : > { %v1406_v17 = vadd.f32 %v1606_v16, %v1390_v57  ;;  %v1334_v32 = vpop.f32.mrb[7].mxu0  ;;  %1429 = vst [vmem:[%s2603_s20 + $0x70] sm:$0xff] %v1413_v28 }
 0x23d   : > { %v1405_v33 = vadd.f32 %v1389_v14, %v1334_v32 }
 0x23e   : > { %1422 = vst [vmem:[%s2603_s20 + $0x38] sm:$0xff] %v1406_v17 }
 0x23f   : > { %1421 = vst [vmem:[%s2603_s20 + $0x30] sm:$0xff] %v1405_v33 }
 0x240   : > { %1726 = shalt.err (!%p1723_p2)
}
 0x241   : > { %s1727_s29 = scalar_lea.hbm %s2636_s11, 2048  ;;  %s1731_s6 = scalar_lea.hbm %s2688_s4, 4096 }
 0x242   : > { %p1728_p4 = scmp.ne.s32.totalorder %s2636_s11, %s1727_s29  ;;  %p1732_p9 = scmp.lt.u32.totalorder %s2636_s11, %s2688_s4 }
 0x243   : > { %p1733_p1 = scmp.lt.u32.totalorder %s1731_s6, %s1727_s29  ;;  %p1735_p6 = scmp.lt.u32.totalorder %s1727_s29, %s2636_s11 }
 0x244   : > { %p1729_p5 = pnand %p1728_p4, %p2695_p11 }
 0x245   : > { %p1734_p3 = por %p1733_p1, %p1732_p9 }
 0x246   : > { %p1730_p7 = pneg %p1729_p5 }
 0x247   : > { %p1736_p12 = por %p1735_p6, %p1734_p3 }
 0x249   : > { %p1737_p13 = pnand %p1736_p12, %p1730_p7 }
 0x24b   : > { %1740 = shalt.err (!%p1737_p13)
}
 0x24c   : > { %s1787_s20 = smov 128   ;;  %s1788_s14 = smov 8  }
 0x24d   : > { %1633 = dma.vmem_to_hbm [thread:$0]  (%p2695_p11), %s2638_s8, 2048, %s2636_s11, %s1432_s19, %s1787_s20, %s1787_s20, %s1788_s14  }
 0x24e PF: > { %s1460_s26 = sand.u32 1, %s1767_s15   ;;  %p2696_p8 = scmp.ne.s32.totalorder %s2693_s28, 0 }
 0x24f   : > { %p2697_p10 = scmp.ge.s32.totalorder %s1779_s18, 2  ;;  %s1461_s10 = scalar_lea.sflag [#allocation4], %s1460_s26 }
 0x251   : > { %p1640_p0 = pnand %p2697_p10, %p2696_p8 }
 0x253   : > { %1762 = dma.done.wait (!%p1640_p0), %s1461_s10, 2048  }
 0x254   : > { %1764 = vsyncadd (!%p1640_p0), %s1461_s10, 4294965248  ;;  %p17_p2 = scmp.ge.s32.totalorder %s1839_s21, 4   ;;  %s2698_s15 = smov %s1771_s16 }
 0x255   : > { %s2699_s16 = smov %s1775_s17  ;;  %s2700_s17 = smov %s1851_s24 }
 0x256   : > { %s2701_s18 = smov %s1839_s21  ;;  %19 = sbr.rel (!%p17_p2) target bundleno = 5 (0x5), region = 81 }
 0x25d   :  { %1466 = vsyncpa [#allocation3], 1 }
 0x25e   :  { %1468 = vsyncpa [#allocation3 + $0x1], 1 }
 0x25f   :  { %1469 = vsyncpa [#allocation4], 1 }
 0x260   :  { %1471 = vsyncpa [#allocation4 + $0x1], 1 }

</bundles_post_ra>
